<compile_context>
chip_gen: v5e
topology: v5e:2x2
jax: 0.10.0
libtpu: 0.0.40
codegen_flags: <defaults>
</compile_context>

<pallas_src>
import math

import jax
import jax.numpy as jnp
from jax import lax
from jax.experimental import pallas as pl
from jax.experimental.pallas import tpu as pltpu

QMIN = 0.0
QMAX = 255.0  # bit_width = 8 -> 2**8 - 1


# ----------------------------------------------------------------------------
# helpers shared by kernels
# ----------------------------------------------------------------------------
def _fake_quant(x, scale, zero_point, flag):
    """Asymmetric fake quantization; identity when flag == 0 (range too small)."""
    inv_scale = 1.0 / scale                      # scalar divide
    x_int = jnp.clip(jnp.round(x * inv_scale + zero_point), QMIN, QMAX)
    x_q = (x_int - zero_point) * scale
    return jnp.where(flag > 0.5, x_q, x)


def qparams(mn, mx):
    """scale / zero_point / enable-flag, mirroring FakeQuantize.forward."""
    rng = mx - mn
    ok = rng >= 1e-8
    scale = jnp.where(ok, rng / (QMAX - QMIN), jnp.float32(1.0))
    zp = jnp.clip(QMIN - jnp.round(mn / scale), QMIN, QMAX)
    flag = ok.astype(jnp.float32)
    return (
        scale.reshape(1).astype(jnp.float32),
        zp.reshape(1).astype(jnp.float32),
        flag.reshape(1).astype(jnp.float32),
    )


def _device_vmem_bytes():
    try:
        return int(pltpu.get_tpu_info().vmem_capacity_bytes)
    except Exception:
        return 64 * 1024 * 1024  # conservative: v7x physical VMEM per core


def _choose_row_tile(rows, cols, target=1024, byte_budget=2 << 20):
    """Row tile for mem-bound elementwise / reduction passes.

    Never returns a tile larger than min(target, byte_budget) when rows exceed
    it (fixes the old full-extent fallback); when rows > tile, the tile is a
    multiple of 8 so a partial last tile stays layout-legal."""
    cap = max(8, (byte_budget // (4 * cols)) // 8 * 8)
    limit = min(target, cap)
    if rows <= limit:
        return rows                      # full second-minor extent: always legal
    return max(8, limit // 8 * 8)


def _choose_q_tile(L, target=512):
    """Query-block size: full L when small, else a multiple-of-8 divisor of L."""
    if L <= target:
        return L
    t = target - (target % 8)
    while t >= 8:
        if L % t == 0:
            return t
        t -= 8
    # TODO(synk): mask partial query blocks for awkward L instead of this fallback.
    return L


def _attn_vmem_limit(L, tq, E):
    """Explicit scoped-VMEM budget for the attention call, capped per device."""
    x_buf = 2 * L * E * 4                      # double-buffered input block
    out_buf = 2 * tq * E * 4                   # double-buffered output block
    w_buf = 2 * (4 * E * E * 2 + 4 * E * 4)    # 4 bf16 weights + 4 f32 biases, x2
    scratch = (2 * L + tq) * E * 2             # k/v/q bf16 scratch
    live = 4 * tq * L * 4 + 3 * tq * E * 4     # score/exp tiles + ctx/out values
    req = int(1.4 * (x_buf + out_buf + w_buf + scratch + live)) + (8 << 20)
    cap = _device_vmem_bytes()
    return int(min(max(req, 32 << 20), int(0.85 * cap)))


# ----------------------------------------------------------------------------
# tiled min/max reduction kernel (MinMaxObserver) -- parallel partials
# ----------------------------------------------------------------------------
def _make_minmax_kernel(total_rows, tile_rows):
    masked = (total_rows % tile_rows) != 0

    def kernel(x_ref, mn_ref, mx_ref):
        x = x_ref[...]
        if masked:
            start = pl.program_id(0) * tile_rows
            rid = lax.broadcasted_iota(jnp.int32, x.shape, 0) + start
            valid = rid < total_rows
            mn_ref[...] = jnp.min(jnp.where(valid, x, jnp.inf)).reshape(1, 1, 1)
            mx_ref[...] = jnp.max(jnp.where(valid, x, -jnp.inf)).reshape(1, 1, 1)
        else:
            mn_ref[...] = jnp.min(x).reshape(1, 1, 1)
            mx_ref[...] = jnp.max(x).reshape(1, 1, 1)

    return kernel


def pallas_minmax(x2d):
    rows, cols = x2d.shape
    tr = _choose_row_tile(rows, cols)
    nt = pl.cdiv(rows, tr)
    mn_p, mx_p = pl.pallas_call(
        _make_minmax_kernel(rows, tr),
        grid=(nt,),
        out_shape=(
            jax.ShapeDtypeStruct((nt, 1, 1), jnp.float32),
            jax.ShapeDtypeStruct((nt, 1, 1), jnp.float32),
        ),
        in_specs=[pl.BlockSpec((tr, cols), lambda i: (i, 0))],
        out_specs=(
            pl.BlockSpec((1, 1, 1), lambda i: (i, 0, 0)),
            pl.BlockSpec((1, 1, 1), lambda i: (i, 0, 0)),
        ),
        compiler_params=pltpu.CompilerParams(dimension_semantics=("parallel",)),
    )(x2d)
    return jnp.min(mn_p), jnp.max(mx_p)


# ----------------------------------------------------------------------------
# tiled elementwise fake-quant kernel (output FakeQuantize)
# ----------------------------------------------------------------------------
def _fq_kernel(scale_ref, zp_ref, flag_ref, x_ref, o_ref):
    # Partial last tile: garbage rows in the pad region are computed but their
    # writeback is clipped to the array bounds by Pallas, so no masking needed.
    o_ref[...] = _fake_quant(x_ref[...], scale_ref[0], zp_ref[0], flag_ref[0])


def pallas_fake_quant(x2d, scale, zp, flag):
    rows, cols = x2d.shape
    tr = _choose_row_tile(rows, cols)
    nt = pl.cdiv(rows, tr)
    smem = pl.BlockSpec(memory_space=pltpu.MemorySpace.SMEM)
    return pl.pallas_call(
        _fq_kernel,
        grid=(nt,),
        out_shape=jax.ShapeDtypeStruct((rows, cols), jnp.float32),
        in_specs=[smem, smem, smem, pl.BlockSpec((tr, cols), lambda i: (i, 0))],
        out_specs=pl.BlockSpec((tr, cols), lambda i: (i, 0)),
        compiler_params=pltpu.CompilerParams(dimension_semantics=("parallel",)),
    )(scale, zp, flag, x2d)


# ----------------------------------------------------------------------------
# multi-head self-attention kernel: grid = (batch, query-blocks)
# ----------------------------------------------------------------------------
def _make_attn_kernel(L, tq, nq, emb, head_dim, group, n_groups):
    gw = group * head_dim  # head-group lane width (128 when heads pack nicely)

    def attn_kernel(
        scale_ref, zp_ref, flag_ref,         # SMEM scalars for input fake quant
        x_ref,                               # (L, E) f32, this batch's sequence
        wq_ref, wk_ref, wv_ref, wo_ref,      # (E, E) bf16 transposed weights
        bq_ref, bk_ref, bv_ref, bo_ref,      # (1, E) f32 biases
        o_ref,                               # (tq, E) f32 output block
        mn_ref, mx_ref,                      # (1, 1, 1) per-batch output min/max
        q_ref,                               # VMEM (n_groups, tq, gw) bf16 scratch
        k_ref,                               # VMEM (n_groups, L, gw) bf16 scratch
        v_ref,                               # VMEM (n_groups, L, gw) bf16 scratch
    ):
        qi = pl.program_id(1)
        s = scale_ref[0]
        zp = zp_ref[0]
        fl = flag_ref[0]

        # ---- K/V projection for the whole sequence, once per batch ----
        @pl.when(qi == 0)
        def _():
            x_full = x_ref[...]                                   # (L, E) f32
            xq_full = _fake_quant(x_full, s, zp, fl).astype(jnp.bfloat16)
            k = (jnp.dot(xq_full, wk_ref[...],
                         preferred_element_type=jnp.float32) + bk_ref[...]
                 ).astype(jnp.bfloat16)
            v = (jnp.dot(x_full.astype(jnp.bfloat16), wv_ref[...],
                         preferred_element_type=jnp.float32) + bv_ref[...]
                 ).astype(jnp.bfloat16)
            for g in range(n_groups):                             # static: stores only
                lo = g * gw
                k_ref[g] = k[:, lo:lo + gw]
                v_ref[g] = v[:, lo:lo + gw]

        # ---- Q projection for this query block (1/sqrt(d) folded into wq/bq) ----
        if nq == 1:
            x_rows = x_ref[...]
        else:
            row0 = pl.multiple_of(qi * tq, tq)
            x_rows = x_ref[pl.ds(row0, tq), :]
        xq_rows = _fake_quant(x_rows, s, zp, fl).astype(jnp.bfloat16)
        q = (jnp.dot(xq_rows, wq_ref[...],
                     preferred_element_type=jnp.float32) + bq_ref[...]
             ).astype(jnp.bfloat16)
        for g in range(n_groups):
            lo = g * gw
            q_ref[g] = q[:, lo:lo + gw]

        # ---- attention + out-projection, one 128-lane head group at a time ----
        def group_body(g, acc):
            qg = q_ref[g]                                         # (tq, gw) bf16
            kg = k_ref[g]                                         # (L,  gw) bf16
            vg = v_ref[g]                                         # (L,  gw) bf16
            parts = []
            for j in range(group):                                # static, small
                lo = j * head_dim
                qh = qg[:, lo:lo + head_dim]
                kh = kg[:, lo:lo + head_dim]
                sc = lax.dot_general(qh, kh, (((1,), (1,)), ((), ())),
                                     preferred_element_type=jnp.float32)
                sc = sc - jnp.max(sc, axis=-1, keepdims=True)
                p = jnp.exp(sc)
                inv = pl.reciprocal(jnp.sum(p, axis=-1, keepdims=True), approx=True)
                ctx = jnp.dot(p.astype(jnp.bfloat16), vg[:, lo:lo + head_dim],
                              preferred_element_type=jnp.float32) * inv
                parts.append(ctx.astype(jnp.bfloat16))
            ctx_g = parts[0] if group == 1 else jnp.concatenate(parts, axis=-1)
            off = pl.multiple_of(g * gw, gw)
            wo_rows = wo_ref[pl.ds(off, gw), :]                   # (gw, E) bf16
            return acc + jnp.dot(ctx_g, wo_rows, preferred_element_type=jnp.float32)

        acc = lax.fori_loop(0, n_groups, group_body,
                            jnp.zeros((tq, emb), jnp.float32),
                            unroll=2 if n_groups > 1 else 1)
        out = acc + bo_ref[...]
        o_ref[...] = out

        # ---- fused output-observer partials, accumulated over query blocks ----
        bmn = jnp.min(out)
        bmx = jnp.max(out)

        @pl.when(qi == 0)
        def _():
            mn_ref[...] = bmn.reshape(1, 1, 1)
            mx_ref[...] = bmx.reshape(1, 1, 1)

        @pl.when(qi != 0)
        def _():
            mn_ref[...] = jnp.minimum(mn_ref[...], bmn)
            mx_ref[...] = jnp.maximum(mx_ref[...], bmx)

    return attn_kernel


# ----------------------------------------------------------------------------
# module wrapper
# ----------------------------------------------------------------------------
def bit_bert_self_attention(hidden_states, params, num_heads, attention_mask=None):
    assert attention_mask is None, "key_padding_mask not supported in this kernel"
    L, N, E = hidden_states.shape
    assert E % num_heads == 0
    head_dim = E // num_heads
    assert head_dim % 8 == 0, "head_dim must be a multiple of 8"
    # Transpose-free layout: view (L, N, E) as (L, N*E); batch b is the
    # column block [b*E, (b+1)*E), which must be 128-lane aligned when N > 1.
    assert N == 1 or E % 128 == 0, \
        "transpose-free layout needs hidden_size % 128 == 0 for batched inputs"
    # TODO(synk): add an explicit-transpose fallback path for E % 128 != 0.

    hs = hidden_states.astype(jnp.float32)

    # ---- input FakeQuantize: observer min/max -> scale/zp (scalars) ----
    mn, mx = pallas_minmax(hs.reshape(L * N, E))
    in_scale, in_zp, in_flag = qparams(mn, mx)

    # ---- weights: bf16 for the MXU, 1/sqrt(head_dim) folded into wq/bq ----
    scaling = 1.0 / math.sqrt(head_dim)
    wq_t = (params["wq"].astype(jnp.float32).T * scaling).astype(jnp.bfloat16)
    wk_t = params["wk"].astype(jnp.float32).T.astype(jnp.bfloat16)
    wv_t = params["wv"].astype(jnp.float32).T.astype(jnp.bfloat16)
    wo_t = params["wo"].astype(jnp.float32).T.astype(jnp.bfloat16)
    bq = (params["bq"].astype(jnp.float32) * scaling).reshape(1, E)
    bk = params["bk"].astype(jnp.float32).reshape(1, E)
    bv = params["bv"].astype(jnp.float32).reshape(1, E)
    bo = params["bo"].astype(jnp.float32).reshape(1, E)

    # Head grouping so per-group slices / matmul contractions are 128-lane dense.
    if head_dim < 128 and 128 % head_dim == 0 and num_heads % (128 // head_dim) == 0:
        group = 128 // head_dim
    else:
        group = 1
    n_groups = num_heads // group
    gw = group * head_dim

    tq = _choose_q_tile(L)
    nq = L // tq

    x2d = hs.reshape(L, N * E)          # free reshape; NO (L,N,E)->(N,L,E) transpose

    smem = pl.BlockSpec(memory_space=pltpu.MemorySpace.SMEM)
    const = lambda b, qi: (0, 0)

    attn2d, mn_b, mx_b = pl.pallas_call(
        _make_attn_kernel(L, tq, nq, E, head_dim, group, n_groups),
        grid=(N, nq),
        out_shape=(
            jax.ShapeDtypeStruct((L, N * E), jnp.float32),
            jax.ShapeDtypeStruct((N, 1, 1), jnp.float32),
            jax.ShapeDtypeStruct((N, 1, 1), jnp.float32),
        ),
        in_specs=[
            smem, smem, smem,                                  # in_scale/zp/flag
            pl.BlockSpec((L, E), lambda b, qi: (0, b)),        # x for batch b
            pl.BlockSpec((E, E), const),                       # wq^T * scaling
            pl.BlockSpec((E, E), const),                       # wk^T
            pl.BlockSpec((E, E), const),                       # wv^T
            pl.BlockSpec((E, E), const),                       # wo^T
            pl.BlockSpec((1, E), const),                       # bq * scaling
            pl.BlockSpec((1, E), const),                       # bk
            pl.BlockSpec((1, E), const),                       # bv
            pl.BlockSpec((1, E), const),                       # bo
        ],
        out_specs=(
            pl.BlockSpec((tq, E), lambda b, qi: (qi, b)),
            pl.BlockSpec((1, 1, 1), lambda b, qi: (b, 0, 0)),
            pl.BlockSpec((1, 1, 1), lambda b, qi: (b, 0, 0)),
        ),
        scratch_shapes=[
            pltpu.VMEM((n_groups, tq, gw), jnp.bfloat16),   # q (current block)
            pltpu.VMEM((n_groups, L, gw), jnp.bfloat16),    # k (full sequence)
            pltpu.VMEM((n_groups, L, gw), jnp.bfloat16),    # v (full sequence)
        ],
        compiler_params=pltpu.CompilerParams(
            dimension_semantics=("parallel", "arbitrary"),
            vmem_limit_bytes=_attn_vmem_limit(L, tq, E),
        ),
    )(in_scale, in_zp, in_flag, x2d, wq_t, wk_t, wv_t, wo_t, bq, bk, bv, bo)

    # ---- output FakeQuantize (observer fused into the attention kernel) ----
    out_scale, out_zp, out_flag = qparams(jnp.min(mn_b), jnp.max(mx_b))
    out_q = pallas_fake_quant(attn2d.reshape(L * N, E), out_scale, out_zp, out_flag)
    return out_q.reshape(L, N, E)       # free reshape back to (L, N, E)


# ----------------------------------------------------------------------------
# pure-JAX reference (for verification)
# ----------------------------------------------------------------------------
def _ref_fake_quant(x):
    mn, mx = jnp.min(x), jnp.max(x)
    rng = mx - mn
    scale = rng / (QMAX - QMIN)
    zp = jnp.clip(QMIN - jnp.round(mn / scale), QMIN, QMAX)
    xq = (jnp.clip(jnp.round(x / scale + zp), QMIN, QMAX) - zp) * scale
    return jnp.where(rng < 1e-8, x, xq)


def _ref_forward(hs, params, num_heads):
    L, N, E = hs.shape
    Dh = E // num_heads
    xq = _ref_fake_quant(hs)
    q = xq @ params["wq"].T + params["bq"]
    k = xq @ params["wk"].T + params["bk"]
    v = hs @ params["wv"].T + params["bv"]

    def split(t):  # (L, N, E) -> (N, H, L, Dh)
        return jnp.transpose(t.reshape(L, N, num_heads, Dh), (1, 2, 0, 3))

    qh, kh, vh = split(q), split(k), split(v)
    sc = jnp.einsum("nhqd,nhkd->nhqk", qh, kh) / math.sqrt(Dh)
    p = jax.nn.softmax(sc, axis=-1)
    ctx = jnp.einsum("nhqk,nhkd->nhqd", p, vh)           # (N, H, L, Dh)
    ctx = jnp.transpose(ctx, (2, 0, 1, 3)).reshape(L, N, E)
    out = ctx @ params["wo"].T + params["bo"]
    return _ref_fake_quant(out)


# ----------------------------------------------------------------------------
if __name__ == "__main__":
    # small, BERT-like config (E multiple of 128 so the transpose-free layout applies)
    L, N, E, H = 8, 2, 128, 4   # seq, batch, hidden, heads (head_dim = 32)

    key = jax.random.PRNGKey(0)
    k_hs, k_ipw, k_ipb, k_ow, k_ob = jax.random.split(key, 5)

    hidden_states = jax.random.normal(k_hs, (L, N, E), jnp.float32)

    # MultiheadAttention parameters: in_proj (3E, E) + (3E,), out_proj (E, E) + (E,)
    in_proj_weight = 0.05 * jax.random.normal(k_ipw, (3 * E, E), jnp.float32)
    in_proj_bias = 0.05 * jax.random.normal(k_ipb, (3 * E,), jnp.float32)
    out_proj_weight = 0.05 * jax.random.normal(k_ow, (E, E), jnp.float32)
    out_proj_bias = 0.05 * jax.random.normal(k_ob, (E,), jnp.float32)

    params = {
        "wq": in_proj_weight[:E],
        "wk": in_proj_weight[E:2 * E],
        "wv": in_proj_weight[2 * E:],
        "bq": in_proj_bias[:E],
        "bk": in_proj_bias[E:2 * E],
        "bv": in_proj_bias[2 * E:],
        "wo": out_proj_weight,
        "bo": out_proj_bias,
    }

    fwd = jax.jit(lambda x: bit_bert_self_attention(x, params, num_heads=H))
    out = jax.block_until_ready(fwd(hidden_states))

    ref = _ref_forward(hidden_states, params, H)
    assert out.shape == (L, N, E)
    # bf16 MXU operands + approx reciprocal + 8-bit fake quant: values near a
    # quantization threshold may flip by one quant step (~5e-3 here), so check
    # max error against ~1-2 quant steps and mean error against bf16 noise.
    err = jnp.abs(out - ref)
    assert float(jnp.max(err)) < 2e-2, f"max err {float(jnp.max(err))}"
    assert float(jnp.mean(err)) < 3e-3, f"mean err {float(jnp.mean(err))}"

    print("KERNEL_OK")
</pallas_src>

<mosaic_0001>
module attributes {stable_mosaic.version = 11 : i64} {
  func.func @kernel(%arg0: i32, %arg1: memref<16x128xf32, #tpu.memory_space<vmem>>, %arg2: memref<1x1x1xf32, #tpu.memory_space<vmem>>, %arg3: memref<1x1x1xf32, #tpu.memory_space<vmem>>) attributes {dimension_semantics = [#tpu.dimension_semantics<parallel>], iteration_bounds = array<i64: 1>, scalar_prefetch = 0 : i64, scratch_operands = 0 : i64, tpu.core_type = #tpu.core_type<tc>, window_params = [{transform_indices = @transform_0, window_bounds = array<i64: 16, 128>}, {transform_indices = @transform_1, window_bounds = array<i64: 1, 1, 1>}, {transform_indices = @transform_2, window_bounds = array<i64: 1, 1, 1>}]} {
    %c0 = arith.constant 0 : index
    %c0_0 = arith.constant 0 : index
    %0 = vector.load %arg1[%c0, %c0_0] : memref<16x128xf32, #tpu.memory_space<vmem>>, vector<16x128xf32>
    %1 = vector.shape_cast %0 : vector<16x128xf32> to vector<1x16x128xf32>
    %cst = arith.constant dense<0x7F800000> : vector<1xf32>
    %2 = vector.multi_reduction <minimumf>, %1, %cst [1, 2] : vector<1x16x128xf32> to vector<1xf32>
    %3 = vector.shape_cast %2 : vector<1xf32> to vector<1x1x1xf32>
    %4 = vector.extract %3[0, 0, 0] : f32 from vector<1x1x1xf32>
    %5 = vector.broadcast %4 : f32 to vector<1x1x1xf32>
    %c0_1 = arith.constant 0 : index
    %c0_2 = arith.constant 0 : index
    %c0_3 = arith.constant 0 : index
    %6 = vector.load %arg2[%c0_1, %c0_2, %c0_3] : memref<1x1x1xf32, #tpu.memory_space<vmem>>, vector<1x1x1xf32>
    tpu.vector_store %arg2[%c0_1, %c0_2, %c0_3], %5 {strides = array<i32>} : memref<1x1x1xf32, #tpu.memory_space<vmem>>, vector<1x1x1xf32>,
    %7 = vector.shape_cast %0 : vector<16x128xf32> to vector<1x16x128xf32>
    %cst_4 = arith.constant dense<0xFF800000> : vector<1xf32>
    %8 = vector.multi_reduction <maximumf>, %7, %cst_4 [1, 2] : vector<1x16x128xf32> to vector<1xf32>
    %9 = vector.shape_cast %8 : vector<1xf32> to vector<1x1x1xf32>
    %10 = vector.extract %9[0, 0, 0] : f32 from vector<1x1x1xf32>
    %11 = vector.broadcast %10 : f32 to vector<1x1x1xf32>
    %c0_5 = arith.constant 0 : index
    %c0_6 = arith.constant 0 : index
    %c0_7 = arith.constant 0 : index
    %12 = vector.load %arg3[%c0_5, %c0_6, %c0_7] : memref<1x1x1xf32, #tpu.memory_space<vmem>>, vector<1x1x1xf32>
    tpu.vector_store %arg3[%c0_5, %c0_6, %c0_7], %11 {strides = array<i32>} : memref<1x1x1xf32, #tpu.memory_space<vmem>>, vector<1x1x1xf32>,
    return
  }
  func.func @transform_0(%arg0: i32) -> (i32, i32) {
    %c0_i32 = arith.constant 0 : i32
    %c0_i32_0 = arith.constant 0 : i32
    return %arg0, %c0_i32 : i32, i32
  }
  func.func @transform_1(%arg0: i32) -> (i32, i32, i32) {
    %c0_i32 = arith.constant 0 : i32
    %c0_i32_0 = arith.constant 0 : i32
    %c0_i32_1 = arith.constant 0 : i32
    return %arg0, %c0_i32, %c0_i32_0 : i32, i32, i32
  }
  func.func @transform_2(%arg0: i32) -> (i32, i32, i32) {
    %c0_i32 = arith.constant 0 : i32
    %c0_i32_0 = arith.constant 0 : i32
    %c0_i32_1 = arith.constant 0 : i32
    return %arg0, %c0_i32, %c0_i32_0 : i32, i32, i32
  }
}

module attributes {stable_mosaic.version = 11 : i64} {
  func.func @attn_kernel(%arg0: i32, %arg1: i32, %arg2: memref<1xf32, #tpu.memory_space<smem>>, %arg3: memref<1xf32, #tpu.memory_space<smem>>, %arg4: memref<1xf32, #tpu.memory_space<smem>>, %arg5: memref<8x128xf32, #tpu.memory_space<vmem>>, %arg6: memref<128x128xbf16, #tpu.memory_space<vmem>>, %arg7: memref<128x128xbf16, #tpu.memory_space<vmem>>, %arg8: memref<128x128xbf16, #tpu.memory_space<vmem>>, %arg9: memref<128x128xbf16, #tpu.memory_space<vmem>>, %arg10: memref<1x128xf32, #tpu.memory_space<vmem>>, %arg11: memref<1x128xf32, #tpu.memory_space<vmem>>, %arg12: memref<1x128xf32, #tpu.memory_space<vmem>>, %arg13: memref<1x128xf32, #tpu.memory_space<vmem>>, %arg14: memref<8x128xf32, #tpu.memory_space<vmem>>, %arg15: memref<1x1x1xf32, #tpu.memory_space<vmem>>, %arg16: memref<1x1x1xf32, #tpu.memory_space<vmem>>, %arg17: memref<1x8x128xbf16, #tpu.memory_space<vmem>>, %arg18: memref<1x8x128xbf16, #tpu.memory_space<vmem>>, %arg19: memref<1x8x128xbf16, #tpu.memory_space<vmem>>) attributes {dimension_semantics = [#tpu.dimension_semantics<parallel>, #tpu.dimension_semantics<arbitrary>], iteration_bounds = array<i64: 2, 1>, scalar_prefetch = 0 : i64, scratch_operands = 3 : i64, tpu.core_type = #tpu.core_type<tc>, window_params = [{transform_indices = @transform_0, window_bounds = array<i64: 1>}, {transform_indices = @transform_1, window_bounds = array<i64: 1>}, {transform_indices = @transform_2, window_bounds = array<i64: 1>}, {transform_indices = @transform_3, window_bounds = array<i64: 8, 128>}, {pipeline_mode = #tpu.pipeline_mode<synchronous>, transform_indices = @transform_4, window_bounds = array<i64: 128, 128>}, {pipeline_mode = #tpu.pipeline_mode<synchronous>, transform_indices = @transform_5, window_bounds = array<i64: 128, 128>}, {pipeline_mode = #tpu.pipeline_mode<synchronous>, transform_indices = @transform_6, window_bounds = array<i64: 128, 128>}, {pipeline_mode = #tpu.pipeline_mode<synchronous>, transform_indices = @transform_7, window_bounds = array<i64: 128, 128>}, {pipeline_mode = #tpu.pipeline_mode<synchronous>, transform_indices = @transform_8, window_bounds = array<i64: 1, 128>}, {pipeline_mode = #tpu.pipeline_mode<synchronous>, transform_indices = @transform_9, window_bounds = array<i64: 1, 128>}, {pipeline_mode = #tpu.pipeline_mode<synchronous>, transform_indices = @transform_10, window_bounds = array<i64: 1, 128>}, {pipeline_mode = #tpu.pipeline_mode<synchronous>, transform_indices = @transform_11, window_bounds = array<i64: 1, 128>}, {transform_indices = @transform_12, window_bounds = array<i64: 8, 128>}, {transform_indices = @transform_13, window_bounds = array<i64: 1, 1, 1>}, {transform_indices = @transform_14, window_bounds = array<i64: 1, 1, 1>}]} {
    %c0 = arith.constant 0 : index
    %0 = memref.load %arg2[%c0] : memref<1xf32, #tpu.memory_space<smem>>
    %c0_0 = arith.constant 0 : index
    %1 = memref.load %arg3[%c0_0] : memref<1xf32, #tpu.memory_space<smem>>
    %c0_1 = arith.constant 0 : index
    %2 = memref.load %arg4[%c0_1] : memref<1xf32, #tpu.memory_space<smem>>
    %c0_i32 = arith.constant 0 : i32
    %3 = arith.cmpi eq, %arg1, %c0_i32 : i32
    %4 = arith.extui %3 : i1 to i32
    %c0_i32_2 = arith.constant 0 : i32
    %5 = arith.cmpi ne, %4, %c0_i32_2 : i32
    scf.if %5 {
      %c0_52 = arith.constant 0 : index
      %c0_53 = arith.constant 0 : index
      %136 = vector.load %arg5[%c0_52, %c0_53] : memref<8x128xf32, #tpu.memory_space<vmem>>, vector<8x128xf32>
      %cst_54 = arith.constant 1.000000e+00 : f32
      %137 = arith.divf %cst_54, %0 : f32
      %138 = vector.broadcast %137 : f32 to vector<8x128xf32>
      %139 = arith.mulf %136, %138 : vector<8x128xf32>
      %140 = vector.broadcast %1 : f32 to vector<8x128xf32>
      %141 = arith.addf %139, %140 : vector<8x128xf32>
      %142 = math.roundeven %141 : vector<8x128xf32>
      %cst_55 = arith.constant 0.000000e+00 : f32
      %cst_56 = arith.constant 2.550000e+02 : f32
      %143 = vector.broadcast %cst_55 : f32 to vector<8x128xf32>
      %144 = arith.maximumf %143, %142 : vector<8x128xf32>
      %145 = vector.broadcast %cst_56 : f32 to vector<8x128xf32>
      %146 = arith.minimumf %145, %144 : vector<8x128xf32>
      %147 = vector.broadcast %1 : f32 to vector<8x128xf32>
      %148 = arith.subf %146, %147 : vector<8x128xf32>
      %149 = vector.broadcast %0 : f32 to vector<8x128xf32>
      %150 = arith.mulf %148, %149 : vector<8x128xf32>
      %cst_57 = arith.constant 5.000000e-01 : f32
      %151 = arith.cmpf ogt, %2, %cst_57 : f32
      %152 = arith.select %151, %150, %136 : vector<8x128xf32>
      %153 = arith.truncf %152 : vector<8x128xf32> to vector<8x128xbf16>
      %c0_58 = arith.constant 0 : index
      %c0_59 = arith.constant 0 : index
      %154 = vector.load %arg7[%c0_58, %c0_59] : memref<128x128xbf16, #tpu.memory_space<vmem>>, vector<128x128xbf16>
      %cst_60 = arith.constant dense<0.000000e+00> : vector<8x128xf32>
      %155 = tpu.matmul %153, %154, %cst_60 {dimension_numbers = #tpu.dot_dimension_numbers<[1], [0], [0], [1], [0, 0, 1, 1], [], []>} : vector<8x128xbf16>, vector<128x128xbf16>, vector<8x128xf32> -> vector<8x128xf32>
      %c0_61 = arith.constant 0 : index
      %c0_62 = arith.constant 0 : index
      %156 = vector.load %arg11[%c0_61, %c0_62] : memref<1x128xf32, #tpu.memory_space<vmem>>, vector<1x128xf32>
      %157 = vector.broadcast %156 : vector<1x128xf32> to vector<8x128xf32>
      %158 = arith.addf %155, %157 : vector<8x128xf32>
      %159 = arith.truncf %158 : vector<8x128xf32> to vector<8x128xbf16>
      %160 = arith.truncf %136 : vector<8x128xf32> to vector<8x128xbf16>
      %c0_63 = arith.constant 0 : index
      %c0_64 = arith.constant 0 : index
      %161 = vector.load %arg8[%c0_63, %c0_64] : memref<128x128xbf16, #tpu.memory_space<vmem>>, vector<128x128xbf16>
      %cst_65 = arith.constant dense<0.000000e+00> : vector<8x128xf32>
      %162 = tpu.matmul %160, %161, %cst_65 {dimension_numbers = #tpu.dot_dimension_numbers<[1], [0], [0], [1], [0, 0, 1, 1], [], []>} : vector<8x128xbf16>, vector<128x128xbf16>, vector<8x128xf32> -> vector<8x128xf32>
      %c0_66 = arith.constant 0 : index
      %c0_67 = arith.constant 0 : index
      %163 = vector.load %arg12[%c0_66, %c0_67] : memref<1x128xf32, #tpu.memory_space<vmem>>, vector<1x128xf32>
      %164 = vector.broadcast %163 : vector<1x128xf32> to vector<8x128xf32>
      %165 = arith.addf %162, %164 : vector<8x128xf32>
      %166 = arith.truncf %165 : vector<8x128xf32> to vector<8x128xbf16>
      %c0_68 = arith.constant 0 : index
      %c0_69 = arith.constant 0 : index
      %c0_70 = arith.constant 0 : index
      %167 = vector.load %arg18[%c0_68, %c0_69, %c0_70] : memref<1x8x128xbf16, #tpu.memory_space<vmem>>, vector<1x8x128xbf16>
      %168 = vector.shape_cast %167 : vector<1x8x128xbf16> to vector<8x128xbf16>
      %169 = vector.shape_cast %159 : vector<8x128xbf16> to vector<1x8x128xbf16>
      tpu.vector_store %arg18[%c0_68, %c0_69, %c0_70], %169 {strides = array<i32>} : memref<1x8x128xbf16, #tpu.memory_space<vmem>>, vector<1x8x128xbf16>,
      %c0_71 = arith.constant 0 : index
      %c0_72 = arith.constant 0 : index
      %c0_73 = arith.constant 0 : index
      %170 = vector.load %arg19[%c0_71, %c0_72, %c0_73] : memref<1x8x128xbf16, #tpu.memory_space<vmem>>, vector<1x8x128xbf16>
      %171 = vector.shape_cast %170 : vector<1x8x128xbf16> to vector<8x128xbf16>
      %172 = vector.shape_cast %166 : vector<8x128xbf16> to vector<1x8x128xbf16>
      tpu.vector_store %arg19[%c0_71, %c0_72, %c0_73], %172 {strides = array<i32>} : memref<1x8x128xbf16, #tpu.memory_space<vmem>>, vector<1x8x128xbf16>,
    } else {
    }
    %c0_3 = arith.constant 0 : index
    %c0_4 = arith.constant 0 : index
    %6 = vector.load %arg5[%c0_3, %c0_4] : memref<8x128xf32, #tpu.memory_space<vmem>>, vector<8x128xf32>
    %cst = arith.constant 1.000000e+00 : f32
    %7 = arith.divf %cst, %0 : f32
    %8 = vector.broadcast %7 : f32 to vector<8x128xf32>
    %9 = arith.mulf %6, %8 : vector<8x128xf32>
    %10 = vector.broadcast %1 : f32 to vector<8x128xf32>
    %11 = arith.addf %9, %10 : vector<8x128xf32>
    %12 = math.roundeven %11 : vector<8x128xf32>
    %cst_5 = arith.constant 0.000000e+00 : f32
    %cst_6 = arith.constant 2.550000e+02 : f32
    %13 = vector.broadcast %cst_5 : f32 to vector<8x128xf32>
    %14 = arith.maximumf %13, %12 : vector<8x128xf32>
    %15 = vector.broadcast %cst_6 : f32 to vector<8x128xf32>
    %16 = arith.minimumf %15, %14 : vector<8x128xf32>
    %17 = vector.broadcast %1 : f32 to vector<8x128xf32>
    %18 = arith.subf %16, %17 : vector<8x128xf32>
    %19 = vector.broadcast %0 : f32 to vector<8x128xf32>
    %20 = arith.mulf %18, %19 : vector<8x128xf32>
    %cst_7 = arith.constant 5.000000e-01 : f32
    %21 = arith.cmpf ogt, %2, %cst_7 : f32
    %22 = arith.select %21, %20, %6 : vector<8x128xf32>
    %23 = arith.truncf %22 : vector<8x128xf32> to vector<8x128xbf16>
    %c0_8 = arith.constant 0 : index
    %c0_9 = arith.constant 0 : index
    %24 = vector.load %arg6[%c0_8, %c0_9] : memref<128x128xbf16, #tpu.memory_space<vmem>>, vector<128x128xbf16>
    %cst_10 = arith.constant dense<0.000000e+00> : vector<8x128xf32>
    %25 = tpu.matmul %23, %24, %cst_10 {dimension_numbers = #tpu.dot_dimension_numbers<[1], [0], [0], [1], [0, 0, 1, 1], [], []>} : vector<8x128xbf16>, vector<128x128xbf16>, vector<8x128xf32> -> vector<8x128xf32>
    %c0_11 = arith.constant 0 : index
    %c0_12 = arith.constant 0 : index
    %26 = vector.load %arg10[%c0_11, %c0_12] : memref<1x128xf32, #tpu.memory_space<vmem>>, vector<1x128xf32>
    %27 = vector.broadcast %26 : vector<1x128xf32> to vector<8x128xf32>
    %28 = arith.addf %25, %27 : vector<8x128xf32>
    %29 = arith.truncf %28 : vector<8x128xf32> to vector<8x128xbf16>
    %c0_13 = arith.constant 0 : index
    %c0_14 = arith.constant 0 : index
    %c0_15 = arith.constant 0 : index
    %30 = vector.load %arg17[%c0_13, %c0_14, %c0_15] : memref<1x8x128xbf16, #tpu.memory_space<vmem>>, vector<1x8x128xbf16>
    %31 = vector.shape_cast %30 : vector<1x8x128xbf16> to vector<8x128xbf16>
    %32 = vector.shape_cast %29 : vector<8x128xbf16> to vector<1x8x128xbf16>
    tpu.vector_store %arg17[%c0_13, %c0_14, %c0_15], %32 {strides = array<i32>} : memref<1x8x128xbf16, #tpu.memory_space<vmem>>, vector<1x8x128xbf16>,
    %cst_16 = arith.constant 0.000000e+00 : f32
    %33 = vector.broadcast %cst_16 : f32 to vector<8x128xf32>
    %c0_i32_17 = arith.constant 0 : i32
    %34 = arith.index_cast %c0_i32_17 : i32 to index
    %c0_18 = arith.constant 0 : index
    %c0_19 = arith.constant 0 : index
    %35 = vector.load %arg17[%34, %c0_18, %c0_19] : memref<1x8x128xbf16, #tpu.memory_space<vmem>>, vector<1x8x128xbf16>
    %36 = vector.shape_cast %35 : vector<1x8x128xbf16> to vector<8x128xbf16>
    %37 = arith.index_cast %c0_i32_17 : i32 to index
    %c0_20 = arith.constant 0 : index
    %c0_21 = arith.constant 0 : index
    %38 = vector.load %arg18[%37, %c0_20, %c0_21] : memref<1x8x128xbf16, #tpu.memory_space<vmem>>, vector<1x8x128xbf16>
    %39 = vector.shape_cast %38 : vector<1x8x128xbf16> to vector<8x128xbf16>
    %40 = arith.index_cast %c0_i32_17 : i32 to index
    %c0_22 = arith.constant 0 : index
    %c0_23 = arith.constant 0 : index
    %41 = vector.load %arg19[%40, %c0_22, %c0_23] : memref<1x8x128xbf16, #tpu.memory_space<vmem>>, vector<1x8x128xbf16>
    %42 = vector.shape_cast %41 : vector<1x8x128xbf16> to vector<8x128xbf16>
    %43 = vector.extract_strided_slice %36 {offsets = [0, 0], sizes = [8, 32], strides = [1, 1]} : vector<8x128xbf16> to vector<8x32xbf16>
    %44 = vector.extract_strided_slice %39 {offsets = [0, 0], sizes = [8, 32], strides = [1, 1]} : vector<8x128xbf16> to vector<8x32xbf16>
    %cst_24 = arith.constant dense<0.000000e+00> : vector<8x8xf32>
    %45 = tpu.matmul %43, %44, %cst_24 {dimension_numbers = #tpu.dot_dimension_numbers<[1], [1], [0], [0], [0, 0, 1, 0], [], []>} : vector<8x32xbf16>, vector<8x32xbf16>, vector<8x8xf32> -> vector<8x8xf32>
    %cst_25 = arith.constant dense<0xFF800000> : vector<8xf32>
    %46 = vector.multi_reduction <maximumf>, %45, %cst_25 [1] : vector<8x8xf32> to vector<8xf32>
    %47 = vector.shape_cast %46 : vector<8xf32> to vector<8x1xf32>
    %48 = vector.broadcast %47 : vector<8x1xf32> to vector<8x8xf32>
    %49 = arith.subf %45, %48 : vector<8x8xf32>
    %50 = math.exp %49 : vector<8x8xf32>
    %cst_26 = arith.constant dense<0.000000e+00> : vector<8xf32>
    %51 = vector.multi_reduction <add>, %50, %cst_26 [1] : vector<8x8xf32> to vector<8xf32>
    %52 = vector.shape_cast %51 : vector<8xf32> to vector<8x1xf32>
    %53 = tpu.reciprocal %52 {approx = true} : vector<8x1xf32> -> vector<8x1xf32>
    %54 = arith.truncf %50 : vector<8x8xf32> to vector<8x8xbf16>
    %55 = vector.extract_strided_slice %42 {offsets = [0, 0], sizes = [8, 32], strides = [1, 1]} : vector<8x128xbf16> to vector<8x32xbf16>
    %cst_27 = arith.constant dense<0.000000e+00> : vector<8x32xf32>
    %56 = tpu.matmul %54, %55, %cst_27 {dimension_numbers = #tpu.dot_dimension_numbers<[1], [0], [0], [1], [0, 0, 1, 1], [], []>} : vector<8x8xbf16>, vector<8x32xbf16>, vector<8x32xf32> -> vector<8x32xf32>
    %57 = vector.broadcast %53 : vector<8x1xf32> to vector<8x32xf32>
    %58 = arith.mulf %56, %57 : vector<8x32xf32>
    %59 = arith.truncf %58 : vector<8x32xf32> to vector<8x32xbf16>
    %60 = vector.extract_strided_slice %36 {offsets = [0, 32], sizes = [8, 32], strides = [1, 1]} : vector<8x128xbf16> to vector<8x32xbf16>
    %61 = vector.extract_strided_slice %39 {offsets = [0, 32], sizes = [8, 32], strides = [1, 1]} : vector<8x128xbf16> to vector<8x32xbf16>
    %cst_28 = arith.constant dense<0.000000e+00> : vector<8x8xf32>
    %62 = tpu.matmul %60, %61, %cst_28 {dimension_numbers = #tpu.dot_dimension_numbers<[1], [1], [0], [0], [0, 0, 1, 0], [], []>} : vector<8x32xbf16>, vector<8x32xbf16>, vector<8x8xf32> -> vector<8x8xf32>
    %cst_29 = arith.constant dense<0xFF800000> : vector<8xf32>
    %63 = vector.multi_reduction <maximumf>, %62, %cst_29 [1] : vector<8x8xf32> to vector<8xf32>
    %64 = vector.shape_cast %63 : vector<8xf32> to vector<8x1xf32>
    %65 = vector.broadcast %64 : vector<8x1xf32> to vector<8x8xf32>
    %66 = arith.subf %62, %65 : vector<8x8xf32>
    %67 = math.exp %66 : vector<8x8xf32>
    %cst_30 = arith.constant dense<0.000000e+00> : vector<8xf32>
    %68 = vector.multi_reduction <add>, %67, %cst_30 [1] : vector<8x8xf32> to vector<8xf32>
    %69 = vector.shape_cast %68 : vector<8xf32> to vector<8x1xf32>
    %70 = tpu.reciprocal %69 {approx = true} : vector<8x1xf32> -> vector<8x1xf32>
    %71 = arith.truncf %67 : vector<8x8xf32> to vector<8x8xbf16>
    %72 = vector.extract_strided_slice %42 {offsets = [0, 32], sizes = [8, 32], strides = [1, 1]} : vector<8x128xbf16> to vector<8x32xbf16>
    %cst_31 = arith.constant dense<0.000000e+00> : vector<8x32xf32>
    %73 = tpu.matmul %71, %72, %cst_31 {dimension_numbers = #tpu.dot_dimension_numbers<[1], [0], [0], [1], [0, 0, 1, 1], [], []>} : vector<8x8xbf16>, vector<8x32xbf16>, vector<8x32xf32> -> vector<8x32xf32>
    %74 = vector.broadcast %70 : vector<8x1xf32> to vector<8x32xf32>
    %75 = arith.mulf %73, %74 : vector<8x32xf32>
    %76 = arith.truncf %75 : vector<8x32xf32> to vector<8x32xbf16>
    %77 = vector.extract_strided_slice %36 {offsets = [0, 64], sizes = [8, 32], strides = [1, 1]} : vector<8x128xbf16> to vector<8x32xbf16>
    %78 = vector.extract_strided_slice %39 {offsets = [0, 64], sizes = [8, 32], strides = [1, 1]} : vector<8x128xbf16> to vector<8x32xbf16>
    %cst_32 = arith.constant dense<0.000000e+00> : vector<8x8xf32>
    %79 = tpu.matmul %77, %78, %cst_32 {dimension_numbers = #tpu.dot_dimension_numbers<[1], [1], [0], [0], [0, 0, 1, 0], [], []>} : vector<8x32xbf16>, vector<8x32xbf16>, vector<8x8xf32> -> vector<8x8xf32>
    %cst_33 = arith.constant dense<0xFF800000> : vector<8xf32>
    %80 = vector.multi_reduction <maximumf>, %79, %cst_33 [1] : vector<8x8xf32> to vector<8xf32>
    %81 = vector.shape_cast %80 : vector<8xf32> to vector<8x1xf32>
    %82 = vector.broadcast %81 : vector<8x1xf32> to vector<8x8xf32>
    %83 = arith.subf %79, %82 : vector<8x8xf32>
    %84 = math.exp %83 : vector<8x8xf32>
    %cst_34 = arith.constant dense<0.000000e+00> : vector<8xf32>
    %85 = vector.multi_reduction <add>, %84, %cst_34 [1] : vector<8x8xf32> to vector<8xf32>
    %86 = vector.shape_cast %85 : vector<8xf32> to vector<8x1xf32>
    %87 = tpu.reciprocal %86 {approx = true} : vector<8x1xf32> -> vector<8x1xf32>
    %88 = arith.truncf %84 : vector<8x8xf32> to vector<8x8xbf16>
    %89 = vector.extract_strided_slice %42 {offsets = [0, 64], sizes = [8, 32], strides = [1, 1]} : vector<8x128xbf16> to vector<8x32xbf16>
    %cst_35 = arith.constant dense<0.000000e+00> : vector<8x32xf32>
    %90 = tpu.matmul %88, %89, %cst_35 {dimension_numbers = #tpu.dot_dimension_numbers<[1], [0], [0], [1], [0, 0, 1, 1], [], []>} : vector<8x8xbf16>, vector<8x32xbf16>, vector<8x32xf32> -> vector<8x32xf32>
    %91 = vector.broadcast %87 : vector<8x1xf32> to vector<8x32xf32>
    %92 = arith.mulf %90, %91 : vector<8x32xf32>
    %93 = arith.truncf %92 : vector<8x32xf32> to vector<8x32xbf16>
    %94 = vector.extract_strided_slice %36 {offsets = [0, 96], sizes = [8, 32], strides = [1, 1]} : vector<8x128xbf16> to vector<8x32xbf16>
    %95 = vector.extract_strided_slice %39 {offsets = [0, 96], sizes = [8, 32], strides = [1, 1]} : vector<8x128xbf16> to vector<8x32xbf16>
    %cst_36 = arith.constant dense<0.000000e+00> : vector<8x8xf32>
    %96 = tpu.matmul %94, %95, %cst_36 {dimension_numbers = #tpu.dot_dimension_numbers<[1], [1], [0], [0], [0, 0, 1, 0], [], []>} : vector<8x32xbf16>, vector<8x32xbf16>, vector<8x8xf32> -> vector<8x8xf32>
    %cst_37 = arith.constant dense<0xFF800000> : vector<8xf32>
    %97 = vector.multi_reduction <maximumf>, %96, %cst_37 [1] : vector<8x8xf32> to vector<8xf32>
    %98 = vector.shape_cast %97 : vector<8xf32> to vector<8x1xf32>
    %99 = vector.broadcast %98 : vector<8x1xf32> to vector<8x8xf32>
    %100 = arith.subf %96, %99 : vector<8x8xf32>
    %101 = math.exp %100 : vector<8x8xf32>
    %cst_38 = arith.constant dense<0.000000e+00> : vector<8xf32>
    %102 = vector.multi_reduction <add>, %101, %cst_38 [1] : vector<8x8xf32> to vector<8xf32>
    %103 = vector.shape_cast %102 : vector<8xf32> to vector<8x1xf32>
    %104 = tpu.reciprocal %103 {approx = true} : vector<8x1xf32> -> vector<8x1xf32>
    %105 = arith.truncf %101 : vector<8x8xf32> to vector<8x8xbf16>
    %106 = vector.extract_strided_slice %42 {offsets = [0, 96], sizes = [8, 32], strides = [1, 1]} : vector<8x128xbf16> to vector<8x32xbf16>
    %cst_39 = arith.constant dense<0.000000e+00> : vector<8x32xf32>
    %107 = tpu.matmul %105, %106, %cst_39 {dimension_numbers = #tpu.dot_dimension_numbers<[1], [0], [0], [1], [0, 0, 1, 1], [], []>} : vector<8x8xbf16>, vector<8x32xbf16>, vector<8x32xf32> -> vector<8x32xf32>
    %108 = vector.broadcast %104 : vector<8x1xf32> to vector<8x32xf32>
    %109 = arith.mulf %107, %108 : vector<8x32xf32>
    %110 = arith.truncf %109 : vector<8x32xf32> to vector<8x32xbf16>
    %111 = tpu.concatenate %59, %76, %93, %110 in 1 : vector<8x32xbf16>, vector<8x32xbf16>, vector<8x32xbf16>, vector<8x32xbf16> -> vector<8x128xbf16>
    %c128_i32 = arith.constant 128 : i32
    %112 = arith.muli %c0_i32_17, %c128_i32 : i32
    %113 = tpu.assume_multiple %112, 128 : i32
    %114 = arith.index_cast %113 : i32 to index
    %c0_40 = arith.constant 0 : index
    %115 = vector.load %arg9[%114, %c0_40] : memref<128x128xbf16, #tpu.memory_space<vmem>>, vector<128x128xbf16>
    %cst_41 = arith.constant dense<0.000000e+00> : vector<8x128xf32>
    %116 = tpu.matmul %111, %115, %cst_41 {dimension_numbers = #tpu.dot_dimension_numbers<[1], [0], [0], [1], [0, 0, 1, 1], [], []>} : vector<8x128xbf16>, vector<128x128xbf16>, vector<8x128xf32> -> vector<8x128xf32>
    %117 = arith.addf %33, %116 : vector<8x128xf32>
    %c1_i32 = arith.constant 1 : i32
    %c0_42 = arith.constant 0 : index
    %c0_43 = arith.constant 0 : index
    %118 = vector.load %arg13[%c0_42, %c0_43] : memref<1x128xf32, #tpu.memory_space<vmem>>, vector<1x128xf32>
    %119 = vector.broadcast %118 : vector<1x128xf32> to vector<8x128xf32>
    %120 = arith.addf %117, %119 : vector<8x128xf32>
    %c0_44 = arith.constant 0 : index
    %c0_45 = arith.constant 0 : index
    %121 = vector.load %arg14[%c0_44, %c0_45] : memref<8x128xf32, #tpu.memory_space<vmem>>, vector<8x128xf32>
    tpu.vector_store %arg14[%c0_44, %c0_45], %120 {strides = array<i32>} : memref<8x128xf32, #tpu.memory_space<vmem>>, vector<8x128xf32>,
    %122 = vector.shape_cast %120 : vector<8x128xf32> to vector<1x8x128xf32>
    %cst_46 = arith.constant dense<0x7F800000> : vector<1xf32>
    %123 = vector.multi_reduction <minimumf>, %122, %cst_46 [1, 2] : vector<1x8x128xf32> to vector<1xf32>
    %124 = vector.shape_cast %123 : vector<1xf32> to vector<1x1x1xf32>
    %125 = vector.extract %124[0, 0, 0] : f32 from vector<1x1x1xf32>
    %126 = vector.shape_cast %120 : vector<8x128xf32> to vector<1x8x128xf32>
    %cst_47 = arith.constant dense<0xFF800000> : vector<1xf32>
    %127 = vector.multi_reduction <maximumf>, %126, %cst_47 [1, 2] : vector<1x8x128xf32> to vector<1xf32>
    %128 = vector.shape_cast %127 : vector<1xf32> to vector<1x1x1xf32>
    %129 = vector.extract %128[0, 0, 0] : f32 from vector<1x1x1xf32>
    %c0_i32_48 = arith.constant 0 : i32
    %130 = arith.cmpi eq, %arg1, %c0_i32_48 : i32
    %131 = arith.extui %130 : i1 to i32
    %c0_i32_49 = arith.constant 0 : i32
    %132 = arith.cmpi ne, %131, %c0_i32_49 : i32
    scf.if %132 {
      %136 = vector.broadcast %125 : f32 to vector<1x1x1xf32>
      %c0_52 = arith.constant 0 : index
      %c0_53 = arith.constant 0 : index
      %c0_54 = arith.constant 0 : index
      %137 = vector.load %arg15[%c0_52, %c0_53, %c0_54] : memref<1x1x1xf32, #tpu.memory_space<vmem>>, vector<1x1x1xf32>
      tpu.vector_store %arg15[%c0_52, %c0_53, %c0_54], %136 {strides = array<i32>} : memref<1x1x1xf32, #tpu.memory_space<vmem>>, vector<1x1x1xf32>,
      %138 = vector.broadcast %129 : f32 to vector<1x1x1xf32>
      %c0_55 = arith.constant 0 : index
      %c0_56 = arith.constant 0 : index
      %c0_57 = arith.constant 0 : index
      %139 = vector.load %arg16[%c0_55, %c0_56, %c0_57] : memref<1x1x1xf32, #tpu.memory_space<vmem>>, vector<1x1x1xf32>
      tpu.vector_store %arg16[%c0_55, %c0_56, %c0_57], %138 {strides = array<i32>} : memref<1x1x1xf32, #tpu.memory_space<vmem>>, vector<1x1x1xf32>,
    } else {
    }
    %c0_i32_50 = arith.constant 0 : i32
    %133 = arith.cmpi ne, %arg1, %c0_i32_50 : i32
    %134 = arith.extui %133 : i1 to i32
    %c0_i32_51 = arith.constant 0 : i32
    %135 = arith.cmpi ne, %134, %c0_i32_51 : i32
    scf.if %135 {
      %c0_52 = arith.constant 0 : index
      %c0_53 = arith.constant 0 : index
      %c0_54 = arith.constant 0 : index
      %136 = vector.load %arg15[%c0_52, %c0_53, %c0_54] : memref<1x1x1xf32, #tpu.memory_space<vmem>>, vector<1x1x1xf32>
      %137 = vector.broadcast %125 : f32 to vector<1x1x1xf32>
      %138 = arith.minimumf %136, %137 : vector<1x1x1xf32>
      %c0_55 = arith.constant 0 : index
      %c0_56 = arith.constant 0 : index
      %c0_57 = arith.constant 0 : index
      %139 = vector.load %arg15[%c0_55, %c0_56, %c0_57] : memref<1x1x1xf32, #tpu.memory_space<vmem>>, vector<1x1x1xf32>
      tpu.vector_store %arg15[%c0_55, %c0_56, %c0_57], %138 {strides = array<i32>} : memref<1x1x1xf32, #tpu.memory_space<vmem>>, vector<1x1x1xf32>,
      %c0_58 = arith.constant 0 : index
      %c0_59 = arith.constant 0 : index
      %c0_60 = arith.constant 0 : index
      %140 = vector.load %arg16[%c0_58, %c0_59, %c0_60] : memref<1x1x1xf32, #tpu.memory_space<vmem>>, vector<1x1x1xf32>
      %141 = vector.broadcast %129 : f32 to vector<1x1x1xf32>
      %142 = arith.maximumf %140, %141 : vector<1x1x1xf32>
      %c0_61 = arith.constant 0 : index
      %c0_62 = arith.constant 0 : index
      %c0_63 = arith.constant 0 : index
      %143 = vector.load %arg16[%c0_61, %c0_62, %c0_63] : memref<1x1x1xf32, #tpu.memory_space<vmem>>, vector<1x1x1xf32>
      tpu.vector_store %arg16[%c0_61, %c0_62, %c0_63], %142 {strides = array<i32>} : memref<1x1x1xf32, #tpu.memory_space<vmem>>, vector<1x1x1xf32>,
    } else {
    }
    return
  }
  func.func @transform_0(%arg0: i32, %arg1: i32) -> i32 {
    %c0_i32 = arith.constant 0 : i32
    %c0_i32_0 = arith.constant 0 : i32
    return %c0_i32 : i32
  }
  func.func @transform_1(%arg0: i32, %arg1: i32) -> i32 {
    %c0_i32 = arith.constant 0 : i32
    %c0_i32_0 = arith.constant 0 : i32
    return %c0_i32 : i32
  }
  func.func @transform_2(%arg0: i32, %arg1: i32) -> i32 {
    %c0_i32 = arith.constant 0 : i32
    %c0_i32_0 = arith.constant 0 : i32
    return %c0_i32 : i32
  }
  func.func @transform_3(%arg0: i32, %arg1: i32) -> (i32, i32) {
    %c0_i32 = arith.constant 0 : i32
    %c0_i32_0 = arith.constant 0 : i32
    return %c0_i32, %arg0 : i32, i32
  }
  func.func @transform_4(%arg0: i32, %arg1: i32) -> (i32, i32) {
    %c0_i32 = arith.constant 0 : i32
    %c0_i32_0 = arith.constant 0 : i32
    %c0_i32_1 = arith.constant 0 : i32
    return %c0_i32, %c0_i32_0 : i32, i32
  }
  func.func @transform_5(%arg0: i32, %arg1: i32) -> (i32, i32) {
    %c0_i32 = arith.constant 0 : i32
    %c0_i32_0 = arith.constant 0 : i32
    %c0_i32_1 = arith.constant 0 : i32
    return %c0_i32, %c0_i32_0 : i32, i32
  }
  func.func @transform_6(%arg0: i32, %arg1: i32) -> (i32, i32) {
    %c0_i32 = arith.constant 0 : i32
    %c0_i32_0 = arith.constant 0 : i32
    %c0_i32_1 = arith.constant 0 : i32
    return %c0_i32, %c0_i32_0 : i32, i32
  }
  func.func @transform_7(%arg0: i32, %arg1: i32) -> (i32, i32) {
    %c0_i32 = arith.constant 0 : i32
    %c0_i32_0 = arith.constant 0 : i32
    %c0_i32_1 = arith.constant 0 : i32
    return %c0_i32, %c0_i32_0 : i32, i32
  }
  func.func @transform_8(%arg0: i32, %arg1: i32) -> (i32, i32) {
    %c0_i32 = arith.constant 0 : i32
    %c0_i32_0 = arith.constant 0 : i32
    %c0_i32_1 = arith.constant 0 : i32
    return %c0_i32, %c0_i32_0 : i32, i32
  }
  func.func @transform_9(%arg0: i32, %arg1: i32) -> (i32, i32) {
    %c0_i32 = arith.constant 0 : i32
    %c0_i32_0 = arith.constant 0 : i32
    %c0_i32_1 = arith.constant 0 : i32
    return %c0_i32, %c0_i32_0 : i32, i32
  }
  func.func @transform_10(%arg0: i32, %arg1: i32) -> (i32, i32) {
    %c0_i32 = arith.constant 0 : i32
    %c0_i32_0 = arith.constant 0 : i32
    %c0_i32_1 = arith.constant 0 : i32
    return %c0_i32, %c0_i32_0 : i32, i32
  }
  func.func @transform_11(%arg0: i32, %arg1: i32) -> (i32, i32) {
    %c0_i32 = arith.constant 0 : i32
    %c0_i32_0 = arith.constant 0 : i32
    %c0_i32_1 = arith.constant 0 : i32
    return %c0_i32, %c0_i32_0 : i32, i32
  }
  func.func @transform_12(%arg0: i32, %arg1: i32) -> (i32, i32) {
    %c0_i32 = arith.constant 0 : i32
    return %arg1, %arg0 : i32, i32
  }
  func.func @transform_13(%arg0: i32, %arg1: i32) -> (i32, i32, i32) {
    %c0_i32 = arith.constant 0 : i32
    %c0_i32_0 = arith.constant 0 : i32
    %c0_i32_1 = arith.constant 0 : i32
    return %arg0, %c0_i32, %c0_i32_0 : i32, i32, i32
  }
  func.func @transform_14(%arg0: i32, %arg1: i32) -> (i32, i32, i32) {
    %c0_i32 = arith.constant 0 : i32
    %c0_i32_0 = arith.constant 0 : i32
    %c0_i32_1 = arith.constant 0 : i32
    return %arg0, %c0_i32, %c0_i32_0 : i32, i32, i32
  }
}

module attributes {stable_mosaic.version = 11 : i64} {
  func.func @_fq_kernel(%arg0: i32, %arg1: memref<1xf32, #tpu.memory_space<smem>>, %arg2: memref<1xf32, #tpu.memory_space<smem>>, %arg3: memref<1xf32, #tpu.memory_space<smem>>, %arg4: memref<16x128xf32, #tpu.memory_space<vmem>>, %arg5: memref<16x128xf32, #tpu.memory_space<vmem>>) attributes {dimension_semantics = [#tpu.dimension_semantics<parallel>], iteration_bounds = array<i64: 1>, scalar_prefetch = 0 : i64, scratch_operands = 0 : i64, tpu.core_type = #tpu.core_type<tc>, window_params = [{transform_indices = @transform_0, window_bounds = array<i64: 1>}, {transform_indices = @transform_1, window_bounds = array<i64: 1>}, {transform_indices = @transform_2, window_bounds = array<i64: 1>}, {transform_indices = @transform_3, window_bounds = array<i64: 16, 128>}, {transform_indices = @transform_4, window_bounds = array<i64: 16, 128>}]} {
    %c0 = arith.constant 0 : index
    %c0_0 = arith.constant 0 : index
    %0 = vector.load %arg4[%c0, %c0_0] : memref<16x128xf32, #tpu.memory_space<vmem>>, vector<16x128xf32>
    %c0_1 = arith.constant 0 : index
    %1 = memref.load %arg1[%c0_1] : memref<1xf32, #tpu.memory_space<smem>>
    %c0_2 = arith.constant 0 : index
    %2 = memref.load %arg2[%c0_2] : memref<1xf32, #tpu.memory_space<smem>>
    %c0_3 = arith.constant 0 : index
    %3 = memref.load %arg3[%c0_3] : memref<1xf32, #tpu.memory_space<smem>>
    %cst = arith.constant 1.000000e+00 : f32
    %4 = arith.divf %cst, %1 : f32
    %5 = vector.broadcast %4 : f32 to vector<16x128xf32>
    %6 = arith.mulf %0, %5 : vector<16x128xf32>
    %7 = vector.broadcast %2 : f32 to vector<16x128xf32>
    %8 = arith.addf %6, %7 : vector<16x128xf32>
    %9 = math.roundeven %8 : vector<16x128xf32>
    %cst_4 = arith.constant 0.000000e+00 : f32
    %cst_5 = arith.constant 2.550000e+02 : f32
    %10 = vector.broadcast %cst_4 : f32 to vector<16x128xf32>
    %11 = arith.maximumf %10, %9 : vector<16x128xf32>
    %12 = vector.broadcast %cst_5 : f32 to vector<16x128xf32>
    %13 = arith.minimumf %12, %11 : vector<16x128xf32>
    %14 = vector.broadcast %2 : f32 to vector<16x128xf32>
    %15 = arith.subf %13, %14 : vector<16x128xf32>
    %16 = vector.broadcast %1 : f32 to vector<16x128xf32>
    %17 = arith.mulf %15, %16 : vector<16x128xf32>
    %cst_6 = arith.constant 5.000000e-01 : f32
    %18 = arith.cmpf ogt, %3, %cst_6 : f32
    %19 = arith.select %18, %17, %0 : vector<16x128xf32>
    %c0_7 = arith.constant 0 : index
    %c0_8 = arith.constant 0 : index
    %20 = vector.load %arg5[%c0_7, %c0_8] : memref<16x128xf32, #tpu.memory_space<vmem>>, vector<16x128xf32>
    tpu.vector_store %arg5[%c0_7, %c0_8], %19 {strides = array<i32>} : memref<16x128xf32, #tpu.memory_space<vmem>>, vector<16x128xf32>,
    return
  }
  func.func @transform_0(%arg0: i32) -> i32 {
    %c0_i32 = arith.constant 0 : i32
    %c0_i32_0 = arith.constant 0 : i32
    return %c0_i32 : i32
  }
  func.func @transform_1(%arg0: i32) -> i32 {
    %c0_i32 = arith.constant 0 : i32
    %c0_i32_0 = arith.constant 0 : i32
    return %c0_i32 : i32
  }
  func.func @transform_2(%arg0: i32) -> i32 {
    %c0_i32 = arith.constant 0 : i32
    %c0_i32_0 = arith.constant 0 : i32
    return %c0_i32 : i32
  }
  func.func @transform_3(%arg0: i32) -> (i32, i32) {
    %c0_i32 = arith.constant 0 : i32
    %c0_i32_0 = arith.constant 0 : i32
    return %arg0, %c0_i32 : i32, i32
  }
  func.func @transform_4(%arg0: i32) -> (i32, i32) {
    %c0_i32 = arith.constant 0 : i32
    %c0_i32_0 = arith.constant 0 : i32
    return %arg0, %c0_i32 : i32, i32
  }
}

</mosaic_0001>

<bundles_post_ra>
// kernel: _lambda_.3
= control target key start
LH: loop header
LB: loop body
LE: loop exit
PB: predicated region body
PF: predicated region fallthrough
CT: control target
= control target key end

     0   :  { %8 = vsyncpa [#allocation3], 0  ;;  %s204_s0 = inlined_call_operand.hbm [shape: f32[16,128], index: 0, kind: input, shape index: {}]   ;;  %s205_s1 = inlined_call_operand.hbm [shape: f32[1,1,1], index: 1, kind: output, shape index: {0}]   ;;  %s206_s2 = inlined_call_operand.hbm [shape: f32[1,1,1], index: 2, kind: output, shape index: {1}]  }
   0x1   :  { %9 = vsyncpa [#allocation4], 0 }
   0x2   :  { %10 = vsyncpa [#allocation7], 0  ;;  %s15_s11 = sshll.u32 %s204_s0, 4  ;;  %s175_s12 = smov [#allocation2]   ;;  %s16_s11 = int_to_ptr.hbm [resolvable:$true] %s15_s11 }
   0x3   :  { %s17_s13 = sshll.u32 %s175_s12, 4  ;;  %s176_s14 = smov 128   ;;  %s18_s13 = int_to_ptr.vmem [resolvable:$true] %s17_s13 }
   0x4   :  { %s177_s15 = smov 8  }
   0x5   :  { %23 = dma.hbm_to_vmem [thread:$0]  %s16_s11, 256, %s18_s13, [#allocation3], %s176_s14, %s176_s14, %s177_s15  }
   0x6   :  { %169 = dma.done.wait [#allocation3], 256  }
   0x7   :  { %170 = vsyncadd [#allocation3], 4294967040  ;;  %v28_v0 = vld [vmem:[#allocation2] sm:$0xff]  ;;  %v29_v1 = vld [vmem:[#allocation2 + $0x8] sm:$0xff]  ;;  %s178_s0 = smov [#allocation5]   ;;  %s62_s19 = sshll.u32 %s205_s1, 4  ;;  %s63_s19 = int_to_ptr.hbm [resolvable:$true] %s62_s19 }
   0x8   :  { %v30_v2 = vmin.f32 %v28_v0, %v29_v1  ;;  %v43_v3 = vmax.f32 %v28_v0, %v29_v1  ;;  %s60_s16 = sshll.u32 %s178_s0, 4  ;;  %vm41_vm0 = vcmask 0   ;;  %s179_s21 = smov [#allocation6]   ;;  %s61_s16 = int_to_ptr.vmem [resolvable:$true] %s60_s16 }
   0x9   :  { %s71_s22 = sshll.u32 %s179_s21, 4  ;;  %s73_s25 = sshll.u32 %s206_s2, 4  ;;  %s72_s22 = int_to_ptr.vmem [resolvable:$true] %s71_s22  ;;  %s74_s25 = int_to_ptr.hbm [resolvable:$true] %s73_s25 }
   0xa   :  { %31 = vmin.xlane.f32.xlu0 %v30_v2 }
  0x12   :  { %44 = vmax.xlane.f32.xlu0 %v43_v3 }
  0x7d   :  { %v32_v4 = vpop.xlane.xlu0 %31 }
  0x7e   :  { %v33_v5 = vrot.slane %v32_v4, 4 }
  0x80   :  { %v34_v6 = vmin.f32 %v32_v4, %v33_v5 }
  0x82   :  { %v35_v7 = vrot.slane %v34_v6, 2 }
  0x84   :  { %v36_v8 = vmin.f32 %v34_v6, %v35_v7 }
  0x85   :  { %v45_v9 = vpop.xlane.xlu0 %44 }
  0x86   :  { %v46_v10 = vrot.slane %v45_v9, 4  ;;  %v37_v11 = vrot.slane %v36_v8, 1 }
  0x88   :  { %v47_v12 = vmax.f32 %v45_v9, %v46_v10  ;;  %v38_v13 = vmin.f32 %v36_v8, %v37_v11 }
  0x8a   :  { %v48_v14 = vrot.slane %v47_v12, 2  ;;  %88 = vpush %v38_v13 }
  0x8c   :  { %v49_v15 = vmax.f32 %v47_v12, %v48_v14 }
  0x8e   :  { %v50_v16 = vrot.slane %v49_v15, 1 }
  0x90   :  { %v51_v17 = vmax.f32 %v49_v15, %v50_v16 }
  0x92   :  { %90 = vpush %v51_v17 }
  0xbb   :  { %s89_s20 = spop %88 }
  0xbc   :  { %v40_v18 = vstv %s89_s20 }
  0xbd   :  { %42 = vst.msk [vmem:[#allocation5] sm:$0x1] %vm41_vm0, %v40_v18 }
  0xbe   :  { %65 = dma.vmem_to_hbm [thread:$0]  %s61_s16, 16, %s63_s19, [#allocation4]  }
  0xc3   :  { %s91_s26 = spop %90 }
  0xc4   :  { %v53_v19 = vstv %s91_s26 }
  0xc5   :  { %54 = vst.msk [vmem:[#allocation6] sm:$0x1] %vm41_vm0, %v53_v19 }
  0xc6   :  { %76 = dma.vmem_to_hbm [thread:$0]  %s72_s22, 16, %s74_s25, [#allocation7]  }
  0xc7   :  { %171 = dma.done.wait [#allocation4], 16  }
  0xc8   :  { %172 = vsyncadd [#allocation4], 4294967280 }
  0xc9   :  { %173 = dma.done.wait [#allocation7], 16  }
  0xca   :  { %174 = vsyncadd [#allocation7], 4294967280 }
  0xcb   :  { %85 = vsyncpa [#allocation3], 1 }
  0xcc   :  { %86 = vsyncpa [#allocation4], 1 }
  0xcd   :  { %87 = vsyncpa [#allocation7], 1 }

// kernel: _lambda_.5
= control target key start
LH: loop header
LB: loop body
LE: loop exit
PB: predicated region body
PF: predicated region fallthrough
CT: control target
= control target key end

     0   :  { %s180_s0 = inlined_call_operand.<no memory space> [shape: f32[1], index: 0, kind: input, shape index: {}]   ;;  %s181_s1 = inlined_call_operand.<no memory space> [shape: f32[1], index: 1, kind: input, shape index: {}]   ;;  %s182_s2 = inlined_call_operand.<no memory space> [shape: f32[1], index: 2, kind: input, shape index: {}]   ;;  %s183_s3 = inlined_call_operand.vmem [shape: f32[16,128], index: 3, kind: input, shape index: {}]   ;;  %s184_s4 = inlined_call_operand.hbm [shape: f32[16,128], index: 4, kind: output, shape index: {}]  }
   0x1   :  { %v26_v0 = vstv %s180_s0 }
   0x2   :  { %12 = vsyncpa [#allocation6], 0  ;;  %106 = vrcp.f32 %v26_v0  ;;  %v38_v3 = vand.u32 2147483648, %v26_v0  ;;  %vm32_vm0 = vweird.f32 %v26_v0  ;;  %v36_v5 = vand.u32 2147483647, %v26_v0  ;;  %v21_v11 = vld [vmem:[%s183_s3] sm:$0xff] }
   0x3   :  { %v22_v12 = vld [vmem:[%s183_s3 + $0x8] sm:$0xff]  ;;  %v45_v14 = vstv %s181_s1  ;;  %p59_p0 = scmp.gt.f32.partialorder %s182_s2, 0.5  ;;  %s134_s3 = smov [#allocation5]  }
   0x4   :  { %v39_v7 = vor.u32 1.1754944e-38, %v38_v3  ;;  %vm37_vm3 = vcmp.eq.f32.partialorder %v36_v5, 8.507059e+37  ;;  %s71_s2 = sshll.u32 %s134_s3, 4  ;;  %s73_s27 = sshll.u32 %s184_s4, 4  ;;  %s72_s2 = int_to_ptr.vmem [resolvable:$true] %s71_s2  ;;  %s74_s27 = int_to_ptr.hbm [resolvable:$true] %s73_s27 }
   0x5   :  { %s60_s1 = scalar_select %p59_p0, 1, 0 }
   0x6   :  { %s135_s28 = smov 128   ;;  %s136_s29 = smov 8  }
   0x7   :  { %v61_v36 = vstv %s60_s1 }
   0x8   :  { %v107_v1 = vpop.eup %106  ;;  %vm62_vm6 = vcmp.eq.s32.totalorder %v61_v36, 1 }
   0x9   :  { %v28_v2 = vmul.f32 %v107_v1, %v26_v0  ;;  %vm33_vm1 = vweird.f32 %v107_v1 }
   0xa   :  { %vm34_vm2 = vmor %vm32_vm0, %vm33_vm1 }
   0xb   :  { %v29_v4 = vsub.f32 1.0, %v28_v2 }
   0xd   :  { %v30_v6 = vmul.f32 %v107_v1, %v29_v4 }
   0xf   :  { %v31_v8 = vadd.f32 %v107_v1, %v30_v6 }
  0x11   :  { %v35_v9 = vsel %vm34_vm2, %v107_v1, %v31_v8 }
  0x12   :  { %v40_v10 = vsel %vm37_vm3, %v39_v7, %v35_v9 }
  0x13   :  { %85 = vpush %v40_v10 }
  0x44   :  { %s86_s20 = spop %85 }
  0x45   :  { %v42_v13 = vstv %s86_s20 }
  0x46   :  { %v43_v15 = vmul.f32 %v42_v13, %v21_v11  ;;  %v44_v16 = vmul.f32 %v42_v13, %v22_v12 }
  0x48   :  { %v46_v17 = vadd.f32 %v45_v14, %v43_v15  ;;  %v47_v18 = vadd.f32 %v45_v14, %v44_v16 }
  0x4a   :  { %v89_v19 = vcvt.f32.s32 %v46_v17  ;;  %v97_v20 = vcvt.f32.s32 %v47_v18  ;;  %v87_v22 = vand.u32 2147483647, %v46_v17  ;;  %v92_v25 = vand.u32 2147483648, %v46_v17 }
  0x4b   :  { %v95_v26 = vand.u32 2147483647, %v47_v18  ;;  %v100_v28 = vand.u32 2147483648, %v47_v18 }
  0x4c   :  { %v90_v21 = vcvt.s32.f32 %v89_v19  ;;  %v98_v23 = vcvt.s32.f32 %v97_v20  ;;  %vm88_vm4 = vcmp.lt.f32.partialorder %v87_v22, 8388608.0 }
  0x4d   :  { %vm96_vm5 = vcmp.lt.f32.partialorder %v95_v26, 8388608.0 }
  0x4e   :  { %v91_v24 = vand.u32 2147483647, %v90_v21  ;;  %v99_v27 = vand.u32 2147483647, %v98_v23 }
  0x50   :  { %v93_v29 = vor.u32 %v92_v25, %v91_v24  ;;  %v101_v30 = vor.u32 %v100_v28, %v99_v27 }
  0x52   :  { %v94_v31 = vsel %vm88_vm4, %v93_v29, %v46_v17  ;;  %v102_v32 = vsel %vm96_vm5, %v101_v30, %v47_v18 }
  0x53   :  { %v50_v33 = vmax.f32 %v94_v31, 0.0  ;;  %v51_v34 = vmax.f32 %v102_v32, 0.0 }
  0x55   :  { %v52_v35 = vmin.f32 %v50_v33, 255.0  ;;  %v53_v37 = vmin.f32 %v51_v34, 255.0 }
  0x57   :  { %v54_v38 = vsub.f32 %v52_v35, %v45_v14  ;;  %v55_v39 = vsub.f32 %v53_v37, %v45_v14 }
  0x59   :  { %v57_v40 = vmul.f32 %v54_v38, %v26_v0  ;;  %v58_v41 = vmul.f32 %v55_v39, %v26_v0 }
  0x5b   :  { %v63_v42 = vsel %vm62_vm6, %v57_v40, %v21_v11  ;;  %v64_v43 = vsel %vm62_vm6, %v58_v41, %v22_v12 }
  0x5c   :  { %65 = vst [vmem:[#allocation5] sm:$0xff] %v63_v42 }
  0x5d   :  { %66 = vst [vmem:[#allocation5 + $0x8] sm:$0xff] %v64_v43 }
  0x5e   :  { %79 = dma.vmem_to_hbm [thread:$0]  %s72_s2, 256, %s74_s27, [#allocation6], %s135_s28, %s135_s28, %s136_s29  }
  0x5f   :  { %132 = dma.done.wait [#allocation6], 256  }
  0x60   :  { %133 = vsyncadd [#allocation6], 4294967040 }
  0x61   :  { %84 = vsyncpa [#allocation6], 1 }

// kernel: _lambda_.4
= control target key start
LH: loop header
LB: loop body
LE: loop exit
PB: predicated region body
PF: predicated region fallthrough
CT: control target
= control target key end

     0   :  { %s2165_s0 = inlined_call_operand.<no memory space> [shape: f32[1], index: 0, kind: input, shape index: {}]   ;;  %s2166_s1 = inlined_call_operand.<no memory space> [shape: f32[1], index: 1, kind: input, shape index: {}]   ;;  %s2167_s2 = inlined_call_operand.<no memory space> [shape: f32[1], index: 2, kind: input, shape index: {}]   ;;  %s2168_s3 = inlined_call_operand.vmem [shape: f32[8,256], index: 3, kind: input, shape index: {}]   ;;  %s2169_s4 = inlined_call_operand.hbm [shape: bf16[128,128], index: 4, kind: input, shape index: {}]   ;;  %s2170_s5 = inlined_call_operand.hbm [shape: bf16[128,128], index: 5, kind: input, shape index: {}]   ;;  %s2171_s6 = inlined_call_operand.hbm [shape: bf16[128,128], index: 6, kind: input, shape index: {}]   ;;  %s2172_s7 = inlined_call_operand.hbm [shape: bf16[128,128], index: 7, kind: input, shape index: {}]   ;;  %s2173_s8 = inlined_call_operand.vmem [shape: f32[1,128], index: 8, kind: input, shape index: {}]   ;;  %s2174_s9 = inlined_call_operand.vmem [shape: f32[1,128], index: 9, kind: input, shape index: {}]   ;;  %s2175_s10 = inlined_call_operand.vmem [shape: f32[1,128], index: 10, kind: input, shape index: {}]   ;;  %s2176_s11 = inlined_call_operand.vmem [shape: f32[1,128], index: 11, kind: input, shape index: {}]   ;;  %s2177_s12 = inlined_call_operand.vmem [shape: f32[8,256], index: 12, kind: output, shape index: {0}]   ;;  %s2178_s13 = inlined_call_operand.vmem [shape: f32[2,1,1], index: 13, kind: output, shape index: {1}]   ;;  %s2179_s14 = inlined_call_operand.vmem [shape: f32[2,1,1], index: 14, kind: output, shape index: {2}]  }
   0x1   :  { %2181 = sst [smem:[#allocation20_spill]] %s2170_s5 }
   0x2   :  { %20 = sst [smem:[#allocation5]] %s2165_s0 }
   0x3   :  { %21 = sst [smem:[#allocation6]] %s2166_s1 }
   0x4   :  { %22 = sst [smem:[#allocation7]] %s2167_s2 }
   0x5   :  { %23 = vsyncpa [#allocation9], 0 }
   0x6   :  { %24 = vsyncpa [#allocation11], 0 }
   0x7   :  { %25 = vsyncpa [#allocation14], 0  ;;  %s1996_s19 = smov 0   ;;  %s1998_s20 = smov 0  }
   0x8   :  { %s2000_s21 = smov 0  }
   0x9 LB: > { %2182 = sst [smem:[#allocation18_spill]] %s1897_s20  ;;  %s1448_s0 = sadd.s32 4294967295, %s1901_s21   ;;  %s1901_s21 = sphi %s2000_s21, %s31_s21   ;;  %s1897_s20 = sphi %s1998_s20, %s2189_s20   ;;  %s1893_s19 = sphi %s1996_s19, %s2188_s19  }
   0xa   : > { %p1450_p0 = scmp.ge.s32.totalorder %s1901_s21, 1  ;;  %p385_p1 = scmp.lt.s32.totalorder %s1901_s21, 3 }
   0xb   : > { %p2014_p2 = scmp.eq.s32.totalorder %s1448_s0, 0  ;;  %s2184_s5 = sld [smem:[#allocation20_spill]] }
   0xc   : > { %p2021_p3 = pnand %p1450_p0, %p385_p1  ;;  %s1903_s25 = smov [#allocation10]  }
   0xd   : > { %s421_s26 = sshll.u32 %s1903_s25, 4  ;;  %s43_s28 = sadd.s32 1, %s1897_s20  ;;  %s422_s26 = int_to_ptr.vmem [resolvable:$true] %s421_s26 }
   0xe   : > { %p1671_p4 = pneg %p2021_p3  ;;  %p45_p6 = scmp.ge.s32.totalorder %s43_s28, 2 }
   0xf   : > { %s1904_s29 = smov 64   ;;  %s1905_s30 = smov 4  }
  0x10   : > { %p2029_p5 = pnand %p2014_p2, %p1671_p4  ;;  %s2191_s28 = smov (%p45_p6, %s43_s28), 0 }
  0x11   : > { %s419_s23 = sshll.u32 %s2184_s5, 4  ;;  %2187 = sst [smem:[#allocation19_spill]] %s2191_s28  ;;  %s420_s23 = int_to_ptr.hbm [resolvable:$true] %s419_s23 }
  0x12   : > { %1677 = dma.hbm_to_vmem [thread:$0]  (!%p2029_p5), %s420_s23, 1024, %s422_s26, [#allocation11], %s1904_s29, %s1904_s29, %s1905_s30  }
  0x13   : > { %s405_s17 = sshll.u32 %s2169_s4, 4  ;;  %s1906_s18 = smov [#allocation8]   ;;  %s406_s17 = int_to_ptr.hbm [resolvable:$true] %s405_s17 }
  0x14   : > { %s407_s0 = sshll.u32 %s1906_s18, 4  ;;  %s433_s25 = sshll.u32 %s2171_s6, 4  ;;  %s408_s0 = int_to_ptr.vmem [resolvable:$true] %s407_s0  ;;  %s434_s25 = int_to_ptr.hbm [resolvable:$true] %s433_s25 }
  0x15   : > { %1674 = dma.hbm_to_vmem [thread:$0]  (!%p2029_p5), %s406_s17, 1024, %s408_s0, [#allocation9], %s1904_s29, %s1904_s29, %s1905_s30  }
  0x16   : > { %s1907_s5 = smov [#allocation12]   ;;  %s447_s20 = sshll.u32 %s2172_s7, 4  ;;  %s448_s20 = int_to_ptr.hbm [resolvable:$true] %s447_s20 }
  0x17   : > { %s435_s23 = sshll.u32 %s1907_s5, 4  ;;  %s1908_s15 = smov [#allocation13]   ;;  %s436_s23 = int_to_ptr.vmem [resolvable:$true] %s435_s23 }
  0x18   : > { %1680 = dma.hbm_to_vmem [thread:$0]  (!%p2029_p5), %s434_s25, 1024, %s436_s23, [#allocation11], %s1904_s29, %s1904_s29, %s1905_s30  }
  0x19   : > { %s449_s16 = sshll.u32 %s1908_s15, 4  ;;  %484 = sbr.rel (%p2021_p3) target bundleno = 1400 (0x578), region = 68  ;;  %s450_s16 = int_to_ptr.vmem [resolvable:$true] %s449_s16 }
  0x1a   : > { %1683 = dma.hbm_to_vmem [thread:$0]  (!%p2029_p5), %s448_s20, 1024, %s450_s16, [#allocation14], %s1904_s29, %s1904_s29, %s1905_s30  }
  0x1e   : > { %1880 = dma.done.wait (%p2014_p2), [#allocation9], 1024  }
  0x1f   : > { %1882 = vsyncadd (%p2014_p2), [#allocation9], 4294966272 }
  0x20   : > { %1884 = dma.done.wait (%p2014_p2), [#allocation11], 2048  }
  0x21   : > { %1886 = vsyncadd (%p2014_p2), [#allocation11], 4294965248 }
  0x22   : > { %1888 = dma.done.wait (%p2014_p2), [#allocation14], 1024  }
  0x23   : > { %1890 = vsyncadd (%p2014_p2), [#allocation14], 4294966272  ;;  %s573_s5 = sld [smem:[#allocation5]]  ;;  %v1608_v1 = vld [vmem:[#allocation10 + $0x38] sm:$0xff]  ;;  %v1607_v3 = vld [vmem:[#allocation10 + $0x30] sm:$0xff]  ;;  %p554_p7 = scmp.lt.s32.totalorder %s1893_s19, 1 }
  0x24   : > { %v1624_v2 = vld [vmem:[#allocation8 + $0x38] sm:$0xff]  ;;  %v1623_v4 = vld [vmem:[#allocation8 + $0x30] sm:$0xff]  ;;  %681 = vmatpush.bf16.msra.mxu0 %v1608_v1  ;;  %v1606_v15 = vld [vmem:[#allocation10 + $0x28] sm:$0xff]  ;;  %s574_s1 = sld [smem:[#allocation6]]  ;;  %vm899_vm6 = vcmask 261120   ;;  %s1909_s25 = smov 32  }
  0x25   : > { %881 = vmatpush.bf16.msra.mxu2 %v1624_v2  ;;  %v1622_v16 = vld [vmem:[#allocation8 + $0x28] sm:$0xff]  ;;  %v1605_v17 = vld [vmem:[#allocation10 + $0x20] sm:$0xff]  ;;  %v1604_v19 = vld [vmem:[#allocation10 + $0x18] sm:$0xff]  ;;  %s2193_s19 = smov (!%p554_p7, %s1893_s19), 1  ;;  %s575_s30 = sld [smem:[#allocation7]]  ;;  %vm919_vm7 = vcmask 64512  }
  0x26   : > { %v1621_v18 = vld [vmem:[#allocation8 + $0x20] sm:$0xff]  ;;  %v1620_v20 = vld [vmem:[#allocation8 + $0x18] sm:$0xff]  ;;  %v1603_v21 = vld [vmem:[#allocation10 + $0x10] sm:$0xff]  ;;  %s1461_s20 = sshll.u32 %s2193_s19, 3  ;;  %s1910_s23 = smov 96   ;;  %vm934_vm8 = vcmask 1043456  }
  0x27   : > { %v1619_v22 = vld [vmem:[#allocation8 + $0x10] sm:$0xff]  ;;  %v1602_v23 = vld [vmem:[#allocation10 + $0x8] sm:$0xff]  ;;  %v1601_v25 = vld [vmem:[#allocation10] sm:$0xff]  ;;  %s557_s28 = scalar_lea.vmem %s2168_s3, %s1461_s20  ;;  %s1911_s26 = smov 64   ;;  %vm1151_vm9 = vcmask 523264   ;;  %vm1154_vm10 = vcmask 785408  }
  0x28   : > { %682 = vmatpush.bf16.msra.mxu0 %v1607_v3  ;;  %v1618_v24 = vld [vmem:[#allocation8 + $0x8] sm:$0xff]  ;;  %v1617_v26 = vld [vmem:[#allocation8] sm:$0xff]  ;;  %v2084_v27 = vld [vmem:[%s557_s28] sm:$0xff]  ;;  %s565_s28 = scalar_lea.vmem %s2177_s12, %s1461_s20  ;;  %vm1262_vm11 = vcmask 0   ;;  %s571_s2 = scalar_lea.vmem %s2179_s14, %s2193_s19 }
  0x29   : > { %v2067_v0 = vstv %s573_s5  ;;  %882 = vmatpush.bf16.msra.mxu2 %v1623_v4  ;;  %v1725_v46 = vld [vmem:[%s2174_s9] ss:$0 sm:$0xff]  ;;  %v1616_v54 = vld [vmem:[#allocation12 + $0x38] sm:$0xff]  ;;  %v1614_v1 = vld [vmem:[#allocation12 + $0x28] sm:$0xff] }
  0x2a   : > { %1729 = vrcp.f32 %v2067_v0  ;;  %v593_v7 = vand.u32 2147483648, %v2067_v0  ;;  %vm587_vm0 = vweird.f32 %v2067_v0  ;;  %v591_v9 = vand.u32 2147483647, %v2067_v0  ;;  %v1726_v50 = vld [vmem:[%s2173_s8] ss:$0 sm:$0xff]  ;;  %764 = vmatpush.bf16.msra.mxu1 %v1616_v54  ;;  %v1613_v2 = vld [vmem:[#allocation12 + $0x20] sm:$0xff] }
  0x2b   : > { %v599_v29 = vstv %s574_s1  ;;  %p607_p8 = scmp.gt.f32.partialorder %s575_s30, 0.5  ;;  %v1615_v56 = vld [vmem:[#allocation12 + $0x30] sm:$0xff]  ;;  %v1612_v3 = vld [vmem:[#allocation12 + $0x18] sm:$0xff]  ;;  %s568_s30 = scalar_lea.vmem %s2178_s13, %s2193_s19 }
  0x2c   : > { %v594_v11 = vor.u32 1.1754944e-38, %v593_v7  ;;  %vm592_vm3 = vcmp.eq.f32.partialorder %v591_v9, 8.507059e+37  ;;  %683 = vmatpush.bf16.msra.mxu0 %v1606_v15  ;;  %v1611_v4 = vld [vmem:[#allocation12 + $0x10] sm:$0xff]  ;;  %v695_v7 = vpack.c.bf16 %v2084_v27, %v2084_v27 }
  0x2d   : > { %883 = vmatpush.bf16.msra.mxu2 %v1622_v16  ;;  %s608_s17 = scalar_select %p607_p8, 1, 0  ;;  %v1727_v16 = vld [vmem:[%s2175_s10] ss:$0 sm:$0xff] }
  0x2e   : > { %765 = vmatpush.bf16.msra.mxu1 %v1615_v56 }
  0x2f   : > { %v609_v41 = vstv %s608_s17 }
  0x30   : > { %v1730_v5 = vpop.eup %1729  ;;  %684 = vmatpush.bf16.msra.mxu0 %v1605_v17  ;;  %vm610_vm5 = vcmp.eq.s32.totalorder %v609_v41, 1 }
  0x31   : > { %v583_v6 = vmul.f32 %v1730_v5, %v2067_v0  ;;  %vm588_vm1 = vweird.f32 %v1730_v5  ;;  %884 = vmatpush.bf16.msra.mxu2 %v1621_v18 }
  0x32   : > { %vm589_vm2 = vmor %vm587_vm0, %vm588_vm1  ;;  %766 = vmatpush.bf16.msra.mxu1 %v1614_v1 }
  0x33   : > { %v584_v8 = vsub.f32 1.0, %v583_v6  ;;  %v1609_v6 = vld [vmem:[#allocation12] sm:$0xff] }
  0x34   : > { %685 = vmatpush.bf16.msra.mxu0 %v1604_v19 }
  0x35   : > { %v585_v10 = vmul.f32 %v1730_v5, %v584_v8  ;;  %885 = vmatpush.bf16.msra.mxu2 %v1620_v20 }
  0x36   : > { %767 = vmatpush.bf16.msra.mxu1 %v1613_v2 }
  0x37   : > { %v586_v12 = vadd.f32 %v1730_v5, %v585_v10 }
  0x38   : > { %686 = vmatpush.bf16.msra.mxu0 %v1603_v21 }
  0x39   : > { %v590_v13 = vsel %vm589_vm2, %v1730_v5, %v586_v12  ;;  %886 = vmatpush.bf16.msra.mxu2 %v1619_v22  ;;  %v1610_v5 = vld [vmem:[#allocation12 + $0x8] sm:$0xff] }
  0x3a   : > { %v595_v14 = vsel %vm592_vm3, %v594_v11, %v590_v13  ;;  %768 = vmatpush.bf16.msra.mxu1 %v1612_v3 }
  0x3b   : > { %1633 = vpush %v595_v14 }
  0x3c   : > { %687 = vmatpush.bf16.msra.mxu0 %v1602_v23 }
  0x3d   : > { %887 = vmatpush.bf16.msra.mxu2 %v1618_v24 }
  0x3e   : > { %769 = vmatpush.bf16.msra.mxu1 %v1611_v4 }
  0x40   : > { %688 = vmatpush.bf16.msra.mxu0 %v1601_v25 }
  0x41   : > { %888 = vmatpush.bf16.msra.mxu2 %v1617_v26 }
  0x42   : > { %770 = vmatpush.bf16.msra.mxu1 %v1610_v5 }
  0x46   : > { %771 = vmatpush.bf16.msra.mxu1 %v1609_v6 }
  0x49   : > { %772 = vmatmul.bf16.vlgmr.msra.gmra.mxu1 %v695_v7 }
  0x6c   : > { %s1634_s29 = spop %1633 }
  0x6d   : > { %v597_v28 = vstv %s1634_s29 }
  0x6e   : > { %v598_v30 = vmul.f32 %v597_v28, %v2084_v27 }
  0x70   : > { %v600_v31 = vadd.f32 %v599_v29, %v598_v30 }
  0x72   : > { %v1637_v32 = vcvt.f32.s32 %v600_v31  ;;  %v1635_v34 = vand.u32 2147483647, %v600_v31  ;;  %v1640_v36 = vand.u32 2147483648, %v600_v31 }
  0x74   : > { %v1638_v33 = vcvt.s32.f32 %v1637_v32  ;;  %vm1636_vm4 = vcmp.lt.f32.partialorder %v1635_v34, 8388608.0 }
  0x76   : > { %v1639_v35 = vand.u32 2147483647, %v1638_v33 }
  0x78   : > { %v1641_v37 = vor.u32 %v1640_v36, %v1639_v35 }
  0x7a   : > { %v1642_v38 = vsel %vm1636_vm4, %v1641_v37, %v600_v31 }
  0x7b   : > { %v602_v39 = vmax.f32 %v1642_v38, 0.0 }
  0x7d   : > { %v603_v40 = vmin.f32 %v602_v39, 255.0 }
  0x7f   : > { %v604_v42 = vsub.f32 %v603_v40, %v599_v29 }
  0x81   : > { %v606_v43 = vmul.f32 %v604_v42, %v2067_v0 }
  0x83   : > { %v611_v44 = vsel %vm610_vm5, %v606_v43, %v2084_v27 }
  0x84   : > { %v612_v45 = vpack.c.bf16 %v611_v44, %v611_v44 }
  0x86   : > { %689 = vmatmul.bf16.vlgmr.msra.gmra.mxu0 %v612_v45  ;;  %889 = vmatmul.bf16.vlgmr.msra.gmra.mxu2 %v612_v45 }
  0xc6   : > { %v773_v17 = vpop.f32.mrf.mxu1 }
  0xc7   : > { %v774_v18 = vadd.f32 %v1727_v16, %v773_v17 }
  0xc9   : > { %v777_v19 = vpack.c.bf16 %v774_v18, %v774_v18 }
  0xcb   : > { %779 = vst [vmem:[#allocation4] sm:$0xf] %v777_v19 }
  0xce   : > { %v775_v20 = vpop.f32.mrf.mxu1 }
  0xcf   : > { %v1629_v20 = vld [vmem:[#allocation13 + $0x20] sm:$0xff] }
  0xd2   : > { %v898_v21 = vld [vmem:[#allocation4] sm:$0xf] }
  0xd3   : > { %v936_v22 = vsel %vm934_vm8, %v898_v21, 0  ;;  %v994_v23 = vunpack.c.l.b16 %v898_v21 }
  0xd5   : > { %v995_v24 = vpack.c.b16 %v994_v23, %v994_v23 }
 0x103   : > { %v690_v47 = vpop.f32.mrf.mxu0 }
 0x104   : > { %v691_v48 = vadd.f32 %v1725_v46, %v690_v47 }
 0x106   : > { %v694_v49 = vpack.c.bf16 %v691_v48, %v691_v48 }
 0x108   : > { %778 = vst [vmem:[#allocation3] sm:$0xf] %v694_v49 }
 0x109   : > { %v890_v51 = vpop.f32.mrf.mxu2 }
 0x10a   : > { %v891_v52 = vadd.f32 %v1726_v50, %v890_v51 }
 0x10b   : > { %v692_v53 = vpop.f32.mrf.mxu0 }
 0x10c   : > { %v894_v55 = vpack.c.bf16 %v891_v52, %v891_v52 }
 0x10e   : > { %895 = vst [vmem:[#allocation2] sm:$0xf] %v894_v55 }
 0x10f   : > { %v897_v57 = vld [vmem:[#allocation3] sm:$0xf] }
 0x110   : > { %v904_v58 = vsel %vm899_vm6, %v897_v57, 0  ;;  %v959_v59 = vunpack.c.l.b16 %v897_v57 }
 0x111   : > { %913 = vmatpush.bf16.xpose.msra.mxu3 %v904_v58  ;;  %v892_v60 = vpop.f32.mrf.mxu2 }
 0x112   : > { %v960_v61 = vpack.c.b16 %v959_v59, %v959_v59 }
 0x114   : > { %1078 = vrot.lane.b32.xlu2 %v960_v61, %s1909_s25 }
 0x115   : > { %v896_v62 = vld [vmem:[#allocation2] sm:$0xf] }
 0x116   : > { %v954_v63 = vunpack.c.l.b16 %v896_v62 }
 0x118   : > { %1559 = vmatmul.msk.bf16.vlgmr.msra.gmra.mxu3 %vm899_vm6, %v896_v62  ;;  %v955_v0 = vpack.c.b16 %v954_v63, %v954_v63 }
 0x119   : > { %945 = vmatpush.bf16.msrb.mxu3 %v936_v22 }
 0x11a   : > { %956 = vrot.lane.b32.xlu1 %v955_v0, %s1910_s23 }
 0x11c   : > { %1019 = vrot.lane.b32.xlu2 %v955_v0, %s1911_s26 }
 0x122   : > { %1021 = vrot.lane.b32.xlu1 %v960_v61, %s1911_s26 }
 0x12a   : > { %1076 = vrot.lane.b32.xlu1 %v955_v0, %s1909_s25 }
 0x16e   : > { %v1079_v9 = vpop.permute.xlu2 %1078 }
 0x16f   : > { %v1084_v34 = vsel %vm899_vm6, %v1079_v9, 0 }
 0x176   : > { %v1020_v14 = vpop.permute.xlu2 %1019 }
 0x18c   : > { %v957_v8 = vpop.permute.xlu1 %956 }
 0x194   : > { %v1022_v10 = vpop.permute.xlu1 %1021 }
 0x195   : > { %v1027_v11 = vsel %vm899_vm6, %v1022_v10, 0  ;;  %v1631_v10 = vld [vmem:[#allocation13 + $0x30] sm:$0xff] }
 0x196   : > { %1036 = vmatpush.bf16.xpose.msrb.mxu2 %v1027_v11  ;;  %v1630_v11 = vld [vmem:[#allocation13 + $0x28] sm:$0xff] }
 0x19b   : > { %v915_v12 = vpop.f32.mrf.mxu3 }
 0x19c   : > { %v920_v13 = vsel %vm919_vm7, %v915_v12, -inf  ;;  %v1077_v36 = vpop.permute.xlu1 %1076 }
 0x19d   : > { %921 = vmax.xlane.f32.xlu0 %v920_v13  ;;  %1563 = vmatmul.msk.bf16.vlgmr.msrb.gmra.mxu2 %vm899_vm6, %v1020_v14 }
 0x1a3   : > { %v917_v15 = vpop.f32.mrf.mxu3 }
 0x1b1   : > { %961 = vrot.lane.b32.xlu0 %v960_v61, %s1910_s23 }
 0x1b9   : > { %996 = vrot.lane.b32.xlu0 %v995_v24, %s1910_s23 }
 0x210   : > { %v922_v25 = vpop.xlane.xlu0 %921 }
 0x211   : > { %v923_v26 = vsub.f32 %v915_v12, %v922_v25 }
 0x213   : > { %v924_v27 = vmul.f32 1.442695, %v923_v26 }
 0x215   : > { %1731 = vpow2.f32 %v924_v27 }
 0x21b   : > { %v1732_v28 = vpop.eup %1731 }
 0x21c   : > { %v930_v29 = vpack.c.bf16 %v1732_v28, %v1732_v28  ;;  %v926_v37 = vsel %vm919_vm7, %v1732_v28, 0.0 }
 0x21e   : > { %1560 = vmatmul.msk.bf16.vlgmr.msrb.gmra.mxu3 %vm919_vm7, %v930_v29 }
 0x220   : > { %v1038_v30 = vpop.f32.mrf.mxu2 }
 0x221   : > { %v1042_v31 = vsel %vm919_vm7, %v1038_v30, -inf }
 0x222   : > { %1043 = vmax.xlane.f32.xlu1 %v1042_v31 }
 0x223   : > { %v962_v32 = vpop.permute.xlu0 %961 }
 0x224   : > { %v967_v33 = vsel %vm899_vm6, %v962_v32, 0 }
 0x225   : > { %976 = vmatpush.bf16.xpose.msra.mxu3 %v967_v33 }
 0x228   : > { %v1040_v35 = vpop.f32.mrf.mxu2 }
 0x229   : > { %v1627_v35 = vld [vmem:[#allocation13 + $0x10] sm:$0xff] }
 0x22b   : > { %v997_v38 = vpop.permute.xlu0 %996 }
 0x22c   : > { %v1002_v39 = vsel %vm934_vm8, %v997_v38, 0 }
 0x22d   : > { %1093 = vmatpush.bf16.xpose.msrb.mxu3 %v1084_v34  ;;  %1011 = vmatpush.bf16.msrb.mxu0 %v1002_v39  ;;  %v1628_v34 = vld [vmem:[#allocation13 + $0x18] sm:$0xff] }
 0x22e   : > { %1561 = vmatmul.msk.bf16.vlgmr.msra.gmra.mxu3 %vm899_vm6, %v957_v8  ;;  %v1632_v8 = vld [vmem:[#allocation13 + $0x38] sm:$0xff] }
 0x22f   : > { %1226 = vmatpush.bf16.msrb.mxu1 %v1632_v8 }
 0x233   : > { %1227 = vmatpush.bf16.msrb.mxu1 %v1631_v10 }
 0x237   : > { %1228 = vmatpush.bf16.msrb.mxu1 %v1630_v11 }
 0x23b   : > { %1110 = vrot.lane.b32.xlu1 %v995_v24, %s1909_s25  ;;  %1229 = vmatpush.bf16.msrb.mxu1 %v1629_v20 }
 0x23e   : > { %1565 = vmatmul.msk.bf16.vlgmr.msrb.gmra.mxu3 %vm899_vm6, %v1077_v36  ;;  %v1626_v36 = vld [vmem:[#allocation13 + $0x8] sm:$0xff] }
 0x23f   : > { %1230 = vmatpush.bf16.msrb.mxu1 %v1628_v34 }
 0x243   : > { %1231 = vmatpush.bf16.msrb.mxu1 %v1627_v35 }
 0x247   : > { %1232 = vmatpush.bf16.msrb.mxu1 %v1626_v36 }
 0x265   : > { %927 = vadd.xlane.f32.xlu1 %v926_v37  ;;  %v1625_v37 = vld [vmem:[#allocation13] sm:$0xff] }
 0x266   : > { %1233 = vmatpush.bf16.msrb.mxu1 %v1625_v37 }
 0x295   : > { %v1044_v41 = vpop.xlane.xlu1 %1043 }
 0x296   : > { %v1045_v51 = vsub.f32 %v1038_v30, %v1044_v41 }
 0x298   : > { %v1046_v52 = vmul.f32 1.442695, %v1045_v51 }
 0x29a   : > { %1733 = vpow2.f32 %v1046_v52 }
 0x2a0   : > { %v1734_v53 = vpop.eup %1733 }
 0x2a1   : > { %v2122_v40 = vpop.f32.mrf.mxu3  ;;  %v1048_v54 = vsel %vm919_vm7, %v1734_v53, 0.0  ;;  %v1052_v61 = vpack.c.bf16 %v1734_v53, %v1734_v53 }
 0x2a9   : > { %v949_v42 = vpop.f32.mrf.mxu3 }
 0x2ad   : > { %v1111_v43 = vpop.permute.xlu1 %1110 }
 0x2ae   : > { %v1116_v44 = vsel %vm934_vm8, %v1111_v43, 0 }
 0x2af   : > { %1125 = vmatpush.bf16.msra.mxu0 %v1116_v44 }
 0x2b1   : > { %v978_v45 = vpop.f32.mrf.mxu3 }
 0x2b2   : > { %v982_v46 = vsel %vm919_vm7, %v978_v45, -inf }
 0x2b3   : > { %983 = vmax.xlane.f32.xlu2 %v982_v46 }
 0x2b9   : > { %v980_v47 = vpop.f32.mrf.mxu3 }
 0x2c1   : > { %v1095_v48 = vpop.f32.mrf.mxu3 }
 0x2c2   : > { %v1099_v49 = vsel %vm919_vm7, %v1095_v48, -inf }
 0x2c3   : > { %1100 = vmax.xlane.f32.xlu0 %v1099_v49  ;;  %v1728_v49 = vld [vmem:[%s2176_s11] ss:$0 sm:$0xff] }
 0x2c9   : > { %v1097_v50 = vpop.f32.mrf.mxu3 }
 0x2cb   : > { %1053 = vrot.lane.b32.xlu2 %v995_v24, %s1911_s26 }
 0x2d8   : > { %v928_v38 = vpop.xlane.xlu1 %927 }
 0x2f4   : > { %1049 = vadd.xlane.f32.xlu2 %v1048_v54 }
 0x326   : > { %v984_v55 = vpop.xlane.xlu2 %983 }
 0x327   : > { %v985_v56 = vsub.f32 %v978_v45, %v984_v55 }
 0x329   : > { %v986_v57 = vmul.f32 1.442695, %v985_v56 }
 0x32b   : > { %1735 = vpow2.f32 %v986_v57 }
 0x32e   : > { %v1054_v58 = vpop.permute.xlu2 %1053 }
 0x32f   : > { %v1059_v59 = vsel %vm934_vm8, %v1054_v58, 0 }
 0x330   : > { %1068 = vmatpush.bf16.msra.mxu2 %v1059_v59 }
 0x331   : > { %v1736_v60 = vpop.eup %1735 }
 0x332   : > { %v988_v62 = vsel %vm919_vm7, %v1736_v60, 0.0  ;;  %v992_v63 = vpack.c.bf16 %v1736_v60, %v1736_v60 }
 0x333   : > { %1564 = vmatmul.msk.bf16.vlgmr.msra.gmra.mxu2 %vm919_vm7, %v1052_v61  ;;  %989 = vadd.xlane.f32.xlu0 %v988_v62 }
 0x334   : > { %1562 = vmatmul.msk.bf16.vlgmr.msrb.gmra.mxu0 %vm919_vm7, %v992_v63 }
 0x336   : > { %v1101_v0 = vpop.xlane.xlu0 %1100 }
 0x337   : > { %v1102_v1 = vsub.f32 %v1095_v48, %v1101_v0 }
 0x339   : > { %v1103_v2 = vmul.f32 1.442695, %v1102_v1 }
 0x33b   : > { %1737 = vpow2.f32 %v1103_v2 }
 0x341   : > { %v1738_v3 = vpop.eup %1737 }
 0x342   : > { %v1109_v4 = vpack.c.bf16 %v1738_v3, %v1738_v3  ;;  %v1105_v5 = vsel %vm919_vm7, %v1738_v3, 0.0 }
 0x343   : > { %1106 = vadd.xlane.f32.xlu0 %v1105_v5 }
 0x344   : > { %1566 = vmatmul.msk.bf16.vlgmr.msra.gmra.mxu0 %vm919_vm7, %v1109_v4 }
 0x367   : > { %v1050_v6 = vpop.xlane.xlu2 %1049 }
 0x368   : > { %1739 = vrcp.f32 %v1050_v6 }
 0x36e   : > { %v1740_v12 = vpop.eup %1739 }
 0x3a6   : > { %v990_v7 = vpop.xlane.xlu0 %989 }
 0x3a7   : > { %1741 = vrcp.f32 %v990_v7 }
 0x3ad   : > { %v1742_v15 = vpop.eup %1741 }
 0x3b1   : > { %v1013_v9 = vpop.f32.mrf.mxu0 }
 0x3b2   : > { %v1017_v17 = vmul.f32 %v1742_v15, %v1013_v9 }
 0x3b4   : > { %v1018_v22 = vpack.c.bf16 %v1017_v17, %v1017_v17 }
 0x3b6   : > { %v1070_v13 = vpop.f32.mrf.mxu2  ;;  %v1107_v16 = vpop.xlane.xlu0 %1106  ;;  %v1134_v26 = vunpack.c.l.b16 %v1018_v22 }
 0x3b7   : > { %v1074_v14 = vmul.f32 %v1740_v12, %v1070_v13  ;;  %1743 = vrcp.f32 %v1107_v16 }
 0x3b8   : > { %v1135_v29 = vpack.c.b16 %v1134_v26, %v1134_v26  ;;  %1745 = vrcp.f32 %v928_v38 }
 0x3b9   : > { %v1075_v18 = vpack.c.bf16 %v1074_v14, %v1074_v14  ;;  %v1015_v19 = vpop.f32.mrf.mxu0 }
 0x3bb   : > { %v1139_v21 = vunpack.c.l.b16 %v1075_v18 }
 0x3bd   : > { %v1140_v23 = vpack.c.b16 %v1139_v21, %v1139_v21  ;;  %v1744_v25 = vpop.eup %1743 }
 0x3be   : > { %v1072_v24 = vpop.f32.mrf.mxu2  ;;  %v1746_v41 = vpop.eup %1745 }
 0x3bf   : > { %1141 = vrot.lane.b32.xlu0 %v1140_v23, %s1911_s26  ;;  %v951_v42 = vmul.f32 %v1746_v41, %v2122_v40 }
 0x3c1   : > { %v1127_v27 = vpop.f32.mrf.mxu0  ;;  %v952_v44 = vpack.c.bf16 %v951_v42, %v951_v42 }
 0x3c2   : > { %v1131_v28 = vmul.f32 %v1744_v25, %v1127_v27 }
 0x3c4   : > { %v1132_v30 = vpack.c.bf16 %v1131_v28, %v1131_v28 }
 0x3c6   : > { %v1144_v31 = vunpack.c.l.b16 %v1132_v30 }
 0x3c7   : > { %1136 = vrot.lane.b32.xlu0 %v1135_v29, %s1909_s25 }
 0x3c8   : > { %v1145_v33 = vpack.c.b16 %v1144_v31, %v1144_v31 }
 0x3c9   : > { %v1129_v32 = vpop.f32.mrf.mxu0 }
 0x3cf   : > { %1146 = vrot.lane.b32.xlu0 %v1145_v33, %s1910_s23 }
 0x431   : > { %v1142_v39 = vpop.permute.xlu0 %1141 }
 0x439   : > { %v1137_v43 = vpop.permute.xlu0 %1136 }
 0x43a   : > { %v1150_v45 = vsel %vm899_vm6, %v952_v44, %v1137_v43 }
 0x43b   : > { %v1153_v47 = vsel %vm1151_vm9, %v1150_v45, %v1142_v39 }
 0x441   : > { %v1147_v46 = vpop.permute.xlu0 %1146 }
 0x442   : > { %v1156_v48 = vsel %vm1154_vm10, %v1153_v47, %v1147_v46 }
 0x443   : > { %1234 = vmatmul.bf16.vlgmr.msrb.gmra.mxu1 %v1156_v48 }
 0x4c0   : > { %v1235_v40 = vpop.f32.mrf.mxu1 }
 0x4c1   : > { %v1236_v50 = vadd.f32 %v1728_v49, %v1235_v40 }
 0x4c3   : > { %1239 = vst [vmem:[%s565_s28] sm:$0xff] %v1236_v50  ;;  %1249 = vmax.xlane.f32.xlu0 %v1236_v50  ;;  %1240 = vmin.xlane.f32.xlu2 %v1236_v50 }
 0x4c8   : > { %v1237_v51 = vpop.f32.mrf.mxu1 }
 0x536   : > { %v1250_v52 = vpop.xlane.xlu0 %1249  ;;  %v1241_v53 = vpop.xlane.xlu2 %1240 }
 0x537   : > { %v1251_v54 = vrot.slane %v1250_v52, 4  ;;  %v1242_v55 = vrot.slane %v1241_v53, 4 }
 0x539   : > { %v1252_v56 = vmax.f32 %v1250_v52, %v1251_v54  ;;  %v1243_v57 = vmin.f32 %v1241_v53, %v1242_v55 }
 0x53b   : > { %v1253_v58 = vrot.slane %v1252_v56, 2  ;;  %v1244_v59 = vrot.slane %v1243_v57, 2 }
 0x53d   : > { %v1254_v60 = vmax.f32 %v1252_v56, %v1253_v58  ;;  %v1245_v61 = vmin.f32 %v1243_v57, %v1244_v59 }
 0x53f   : > { %v1246_v62 = vrot.slane %v1245_v61, 1  ;;  %v1255_v63 = vrot.slane %v1254_v60, 1 }
 0x541   : > { %v1247_v0 = vmin.f32 %v1245_v61, %v1246_v62  ;;  %v1256_v1 = vmax.f32 %v1254_v60, %v1255_v63 }
 0x543   : > { %1651 = vpush %v1247_v0 }
 0x544   : > { %1653 = vpush %v1256_v1 }
 0x574   : > { %s1652_s17 = spop %1651 }
 0x575   : > { %v1261_v2 = vstv %s1652_s17  ;;  %s1654_s22 = spop %1653 }
 0x576   : > { %1263 = vst.msk [vmem:[%s568_s30] sm:$0x1] %vm1262_vm11, %v1261_v2  ;;  %v1264_v3 = vstv %s1654_s22 }
 0x577   : > { %1265 = vst.msk [vmem:[%s571_s2] sm:$0x1] %vm1262_vm11, %v1264_v3 }
 0x578 PF: > { %s31_s21 = sadd.s32 1, %s1901_s21   ;;  %s2188_s19 = sld [smem:[#allocation18_spill]] }
 0x579   : > { %p28_p9 = scmp.ge.s32.totalorder %s31_s21, 4   ;;  %s2189_s20 = sld [smem:[#allocation19_spill]] }
 0x57b   :  { %30 = sbr.rel (!%p28_p9) target bundleno = 9 (0x9), region = 151 }
 0x580   :  { %1330 = vsyncpa [#allocation9], 1 }
 0x581   :  { %1332 = vsyncpa [#allocation9 + $0x1], 1 }
 0x582   :  { %1333 = vsyncpa [#allocation11], 1 }
 0x583   :  { %1334 = vsyncpa [#allocation14], 1 }

</bundles_post_ra>
